<compile_context>
chip_gen: v6e
topology: v6e:2x2x1
jax: 0.10.0
libtpu: 0.0.40
codegen_flags: <defaults>
</compile_context>

<pallas_src>
import functools

import jax
import jax.numpy as jnp
from jax.experimental import pallas as pl
from jax.experimental.pallas import tpu as pltpu


# ----------------------------------------------------------------------------
# In-kernel helpers (traced inline -> still one fused kernel)
# ----------------------------------------------------------------------------
def _normalized_kernel(k):
    """abs, replace zeros by the smallest nonzero entry (finite fallback for an
       all-zero matrix), normalize by sqrt(diag outer product)."""
    f32 = jnp.float32
    m = k.shape[0]
    ka = jnp.abs(k)
    pos = jnp.where(ka > 0.0, ka, jnp.inf)
    min_nz = jnp.min(jnp.min(pos, axis=1, keepdims=True), axis=0, keepdims=True)
    min_nz = jnp.where(jnp.isfinite(min_nz), min_nz, 1.0)        # all-zero guard
    ka = jnp.where(ka == 0.0, min_nz, ka)
    rr = jax.lax.broadcasted_iota(jnp.int32, (m, m), 0)
    cc = jax.lax.broadcasted_iota(jnp.int32, (m, m), 1)
    masked = jnp.where(rr == cc, ka, 0.0)
    d_col = jnp.sum(masked, axis=1, keepdims=True)               # (m,1) lane reduce
    d_row = jnp.dot(jnp.ones((1, m), f32), masked,
                    preferred_element_type=f32)                  # (1,m) on the MXU
    prod = d_col * d_row
    safe = jnp.where(prod > 0.0, prod, 1.0)
    return ka * jnp.where(prod > 0.0, jax.lax.rsqrt(safe), 0.0)


# ----------------------------------------------------------------------------
# Single fused forward kernel
# ----------------------------------------------------------------------------
def _fused_forward_kernel(drug_size, mic_size, layout, gammas, beta,
                          graph_ref, params_ref, o_ref):
    n = drug_size + mic_size
    f32 = jnp.float32

    def p(name):                                   # static slice into the param pack
        off, rows, cols = layout[name]
        return params_ref[off:off + rows, 0:cols]

    # ---- hoisted constants (JAX does not CSE broadcasted_iota: build once) ----
    r = jax.lax.broadcasted_iota(jnp.int32, (n, n), 0)
    c = jax.lax.broadcasted_iota(jnp.int32, (n, n), 1)
    eye_mask = r == c
    eye_f = eye_mask.astype(f32)
    ones_row = jnp.ones((1, n), f32)
    row_idx = jax.lax.broadcasted_iota(jnp.int32, (n, 1), 0)
    is_drug_row = (row_idx < drug_size).astype(f32)              # (n,1)

    # ---- unpack graph pack: [feature ; adj ; blockdiag(drug_sim, mic_sim)] ----
    feature = graph_ref[0:n, :]
    adj = graph_ref[n:2 * n, :]
    acc = graph_ref[2 * n:3 * n, :]    # 4th kernel of each fusion; off-diag blocks unused

    # ---- GCNConv normalization: A_hat = A + I, A_norm = D^-1/2 A_hat D^-1/2 ----
    a_hat = adj + eye_f
    deg_col = jnp.sum(a_hat, axis=1, keepdims=True)                      # (n,1)
    deg_row = jnp.dot(ones_row, a_hat, preferred_element_type=f32)       # (1,n) MXU (A_hat sym.)
    dinv_col = jnp.where(deg_col > 0.0,
                         jax.lax.rsqrt(jnp.where(deg_col > 0.0, deg_col, 1.0)), 0.0)
    dinv_row = jnp.where(deg_row > 0.0,
                         jax.lax.rsqrt(jnp.where(deg_row > 0.0, deg_row, 1.0)), 0.0)
    a_norm = a_hat * dinv_col * dinv_row

    h = feature
    layer_names = (("w1", "b1"), ("w2", "b2"), ("w3", "b3"))
    for (wn, bn), gamma in zip(layer_names, gammas):
        # GCN layer: relu(A_norm @ (X @ W) + b)
        hw = jnp.dot(h, p(wn), preferred_element_type=f32)
        h = jnp.maximum(jnp.dot(a_norm, hw, preferred_element_type=f32) + p(bn), 0.0)

        # KATZ (order-2 truncated series on S = H @ H^T), no transposes materialized.
        # TODO(synk): exact katzhmda_py source not shipped with the module.
        s = jax.lax.dot_general(h, h, (((1,), (1,)), ((), ())),
                                preferred_element_type=f32)              # H @ H^T
        ww = beta * s + (beta * beta) * jnp.dot(s, s, preferred_element_type=f32)

        # Merged full-N GIP kernel: one min-max pass, one Gram, one diag/dist pass;
        # row-dependent bandwidth scale keeps the drug/mic blocks exactly equal to
        # the per-block computation of the reference model.
        # TODO(synk): getMinKernel source not shipped; standard GIP formula used.
        ymin = jnp.min(ww, axis=1, keepdims=True)
        ymax = jnp.max(ww, axis=1, keepdims=True)
        rng = ymax - ymin
        yn = (ww - ymin) / jnp.where(rng == 0.0, 1.0, rng)
        gram = jax.lax.dot_general(yn, yn, (((1,), (1,)), ((), ())),
                                   preferred_element_type=f32)           # yn @ yn^T
        masked = jnp.where(eye_mask, gram, 0.0)
        d_col = jnp.sum(masked, axis=1, keepdims=True)                   # (n,1)
        d_row = jnp.dot(ones_row, masked, preferred_element_type=f32)    # (1,n) MXU, not XLU
        sum_drug = jnp.sum(d_col * is_drug_row, axis=0, keepdims=True)   # (1,1)
        sum_mic = jnp.sum(d_col, axis=0, keepdims=True) - sum_drug
        inv_drug = jnp.where(sum_drug > 0.0,
                             drug_size / jnp.where(sum_drug > 0.0, sum_drug, 1.0), 1.0)
        inv_mic = jnp.where(sum_mic > 0.0,
                            mic_size / jnp.where(sum_mic > 0.0, sum_mic, 1.0), 1.0)
        scale = is_drug_row * inv_drug + (1.0 - is_drug_row) * inv_mic   # (n,1)
        dist = d_col + d_row - 2.0 * gram
        acc = acc + jnp.exp((-gamma) * scale * dist)

    # drug_ps = mic_ps = ones(4)/4 ; slice the two kernel blocks once at the end.
    drug_k_n = _normalized_kernel(0.25 * acc[0:drug_size, 0:drug_size])
    mic_k_n = _normalized_kernel(0.25 * acc[drug_size:n, drug_size:n])
    # TODO(synk): laplacian(drug_k)/laplacian(mic_k) feed only the training loss
    #             (not the forward output); np.savetxt file writes omitted.

    # Fused epilogue: out = 0.5 * (drug_k_n @ alpha1 + alpha2^T @ mic_k_n)
    # (single MXU pass; out2.T uses the exact symmetry of mic_k_n).
    lhs = jnp.concatenate([drug_k_n, p("alpha2t")], axis=1)              # (drug, n)
    rhs = jnp.concatenate([p("alpha1"), mic_k_n], axis=0)                # (n, mic)
    o_ref[...] = 0.5 * jnp.dot(lhs, rhs, preferred_element_type=f32)


# ----------------------------------------------------------------------------
# Wrapper: one pallas_call, two packed VMEM-resident operands
# ----------------------------------------------------------------------------
def model_forward(params, feature, adj_dense, drug_size, mic_size, h_gammas, beta):
    f32 = jnp.float32
    drug_size = int(drug_size)
    mic_size = int(mic_size)
    n = drug_size + mic_size
    w1, b1 = params["gcn1"]
    w2, b2 = params["gcn2"]
    w3, b3 = params["gcn3"]

    # ---- pack 1: graph data  [feature ; adj ; blockdiag(drug_sim, mic_sim)] ----
    graph = jnp.zeros((3 * n, n), f32)
    graph = graph.at[0:n].set(feature.astype(f32))
    graph = graph.at[n:2 * n].set(adj_dense.astype(f32))
    graph = graph.at[2 * n:2 * n + drug_size, 0:drug_size].set(
        params["drug_sim"].astype(f32))
    graph = graph.at[2 * n + drug_size:3 * n, drug_size:n].set(
        params["mic_sim"].astype(f32))

    # ---- pack 2: all small parameters in one sublane-aligned buffer ----
    entries = {
        "w1": w1.astype(f32), "b1": b1.reshape(1, -1).astype(f32),
        "w2": w2.astype(f32), "b2": b2.reshape(1, -1).astype(f32),
        "w3": w3.astype(f32), "b3": b3.reshape(1, -1).astype(f32),
        "alpha1": params["alpha1"].astype(f32),
        "alpha2t": params["alpha2"].astype(f32).T,   # one-time 1.5 KiB transpose
    }
    width = max(a.shape[1] for a in entries.values())
    layout, off = {}, 0
    for name, arr in entries.items():
        layout[name] = (off, arr.shape[0], arr.shape[1])
        off += -(-arr.shape[0] // 8) * 8             # keep sublane offsets 8-aligned
    pack = jnp.zeros((off, width), f32)
    for name, arr in entries.items():
        o, rows, cols = layout[name]
        pack = pack.at[o:o + rows, 0:cols].set(arr)

    kernel = functools.partial(
        _fused_forward_kernel, drug_size, mic_size, layout,
        tuple(float(g) for g in h_gammas), float(beta))
    return pl.pallas_call(
        kernel,
        out_shape=jax.ShapeDtypeStruct((drug_size, mic_size), f32),
        in_specs=[pl.BlockSpec(memory_space=pltpu.MemorySpace.VMEM),
                  pl.BlockSpec(memory_space=pltpu.MemorySpace.VMEM)],
        out_specs=pl.BlockSpec(memory_space=pltpu.MemorySpace.VMEM),
    )(graph, pack)


# ----------------------------------------------------------------------------
# Pure-JAX reference of the same math (validates the Pallas lowering)
# ----------------------------------------------------------------------------
def _reference_forward(params, feature, adj_dense, drug_size, mic_size,
                       h_gammas, beta):
    hi = jax.lax.Precision.HIGHEST
    f32 = jnp.float32
    n = drug_size + mic_size
    a_hat = adj_dense.astype(f32) + jnp.eye(n, dtype=f32)
    deg = jnp.sum(a_hat, axis=1)
    dinv = jnp.where(deg > 0, 1.0 / jnp.sqrt(deg), 0.0)
    a_norm = a_hat * dinv[:, None] * dinv[None, :]

    def gip(y, m, gamma):
        ymin = jnp.min(y, axis=1, keepdims=True)
        ymax = jnp.max(y, axis=1, keepdims=True)
        rng = jnp.where(ymax - ymin == 0.0, 1.0, ymax - ymin)
        yn = (y - ymin) / rng
        g = jnp.dot(yn, yn.T, precision=hi)
        d = jnp.diagonal(g)
        s = jnp.sum(d)
        inv_mean = jnp.where(s > 0, m / s, 1.0)
        dist = d[:, None] + d[None, :] - 2.0 * g
        return jnp.exp(-gamma * inv_mean * dist)

    def normk(k):
        ka = jnp.abs(k)
        mn = jnp.min(jnp.where(ka > 0, ka, jnp.inf))
        mn = jnp.where(jnp.isfinite(mn), mn, 1.0)
        ka = jnp.where(ka == 0.0, mn, ka)
        d = jnp.diagonal(ka)
        return ka / jnp.sqrt(d[:, None] * d[None, :])

    h = feature.astype(f32)
    dacc = params["drug_sim"].astype(f32)
    macc = params["mic_sim"].astype(f32)
    for name, gamma in zip(("gcn1", "gcn2", "gcn3"), h_gammas):
        w, b = params[name]
        h = jnp.maximum(jnp.dot(a_norm, jnp.dot(h, w.astype(f32), precision=hi),
                                precision=hi) + b.astype(f32), 0.0)
        s = jnp.dot(h, h.T, precision=hi)
        ww = beta * s + beta * beta * jnp.dot(s, s, precision=hi)
        dacc = dacc + gip(ww[:drug_size], drug_size, gamma)
        macc = macc + gip(ww[drug_size:], mic_size, gamma)
    dk = normk(0.25 * dacc)
    mk = normk(0.25 * macc)
    out1 = jnp.dot(dk, params["alpha1"].astype(f32), precision=hi)
    out2 = jnp.dot(mk, params["alpha2"].astype(f32), precision=hi)
    return 0.5 * (out1 + out2.T)


# ----------------------------------------------------------------------------
# Driver
# ----------------------------------------------------------------------------
if __name__ == "__main__":
    key = jax.random.PRNGKey(0)
    drug_size, mic_size = 16, 24
    N = drug_size + mic_size
    F1, F2, F3 = 32, 16, 8
    h_gammas = (2.0 ** -3, 2.0 ** -3, 2.0 ** -3)   # h1_gamma, h2_gamma, h3_gamma
    beta = 0.01

    ks = jax.random.split(key, 8)
    # association matrix and similarity matrices
    dm = (jax.random.uniform(ks[0], (drug_size, mic_size)) < 0.3).astype(jnp.float32)
    ds = jax.random.uniform(ks[1], (drug_size, drug_size))
    drug_sim = ((ds + ds.T) / 2.0).at[jnp.arange(drug_size),
                                      jnp.arange(drug_size)].set(1.0)
    ms = jax.random.uniform(ks[2], (mic_size, mic_size))
    mic_sim = ((ms + ms.T) / 2.0).at[jnp.arange(mic_size),
                                     jnp.arange(mic_size)].set(1.0)

    # dense heterogeneous adjacency (bipartite drug-microbe graph)
    adj = jnp.zeros((N, N), jnp.float32)
    adj = adj.at[:drug_size, drug_size:].set(dm)
    adj = adj.at[drug_size:, :drug_size].set(dm.T)

    # node features: integrated similarity/association block matrix (N x N)
    feature = jnp.block([[drug_sim, dm], [dm.T, mic_sim]]).astype(jnp.float32)

    def glorot(k, fan_in, fan_out):
        lim = jnp.sqrt(6.0 / (fan_in + fan_out))
        return jax.random.uniform(k, (fan_in, fan_out), jnp.float32, -lim, lim)

    params = {
        "gcn1": (glorot(ks[3], N, F1), jnp.zeros((F1,), jnp.float32)),
        "gcn2": (glorot(ks[4], F1, F2), jnp.zeros((F2,), jnp.float32)),
        "gcn3": (glorot(ks[5], F2, F3), jnp.zeros((F3,), jnp.float32)),
        "alpha1": jax.random.normal(ks[6], (drug_size, mic_size), jnp.float32),
        "alpha2": jax.random.normal(ks[7], (mic_size, drug_size), jnp.float32),
        "drug_sim": drug_sim,
        "mic_sim": mic_sim,
    }

    out = model_forward(params, feature, adj, drug_size, mic_size,
                        h_gammas, beta)
    out = jax.block_until_ready(out)
    assert out.shape == (drug_size, mic_size)
    assert bool(jnp.all(jnp.isfinite(out)))

    ref = _reference_forward(params, feature, adj, drug_size, mic_size,
                             h_gammas, beta)
    abs_err = float(jnp.max(jnp.abs(out - ref)))
    rel_err = abs_err / (float(jnp.max(jnp.abs(ref))) + 1e-12)
    assert (abs_err < 1e-2) or (rel_err < 1e-3), \
        f"mismatch vs pure-JAX reference: abs={abs_err} rel={rel_err}"
    print("KERNEL_OK")
</pallas_src>

<mosaic_0001>
module attributes {stable_mosaic.version = 11 : i64} {
  func.func @_fused_forward_kernel(%arg0: memref<120x40xf32, #tpu.memory_space<vmem>>, %arg1: memref<144x32xf32, #tpu.memory_space<vmem>>, %arg2: memref<16x24xf32, #tpu.memory_space<vmem>>) attributes {dimension_semantics = [], scalar_prefetch = 0 : i64, scratch_operands = 0 : i64, tpu.core_type = #tpu.core_type<tc>} {
    %0 = tpu.iota {dimensions = array<i32: 0>} : vector<40x40xi32>
    %1 = tpu.iota {dimensions = array<i32: 1>} : vector<40x40xi32>
    %2 = arith.cmpi eq, %0, %1 : vector<40x40xi32>
    %3 = arith.extui %2 : vector<40x40xi1> to vector<40x40xi32>
    %4 = arith.sitofp %3 : vector<40x40xi32> to vector<40x40xf32>
    %cst = arith.constant 1.000000e+00 : f32
    %5 = vector.broadcast %cst : f32 to vector<1x40xf32>
    %6 = tpu.iota {dimensions = array<i32: 0>} : vector<40x1xi32>
    %c16_i32 = arith.constant 16 : i32
    %7 = vector.broadcast %c16_i32 : i32 to vector<40x1xi32>
    %8 = arith.cmpi slt, %6, %7 : vector<40x1xi32>
    %9 = arith.extui %8 : vector<40x1xi1> to vector<40x1xi32>
    %10 = arith.sitofp %9 : vector<40x1xi32> to vector<40x1xf32>
    %c0 = arith.constant 0 : index
    %c0_0 = arith.constant 0 : index
    %11 = vector.load %arg0[%c0, %c0_0] : memref<120x40xf32, #tpu.memory_space<vmem>>, vector<40x40xf32>
    %c40 = arith.constant 40 : index
    %c0_1 = arith.constant 0 : index
    %12 = vector.load %arg0[%c40, %c0_1] : memref<120x40xf32, #tpu.memory_space<vmem>>, vector<40x40xf32>
    %c80 = arith.constant 80 : index
    %c0_2 = arith.constant 0 : index
    %13 = vector.load %arg0[%c80, %c0_2] : memref<120x40xf32, #tpu.memory_space<vmem>>, vector<40x40xf32>
    %14 = arith.addf %12, %4 : vector<40x40xf32>
    %cst_3 = arith.constant dense<0.000000e+00> : vector<40xf32>
    %15 = vector.multi_reduction <add>, %14, %cst_3 [1] : vector<40x40xf32> to vector<40xf32>
    %16 = vector.shape_cast %15 : vector<40xf32> to vector<40x1xf32>
    %cst_4 = arith.constant dense<0.000000e+00> : vector<1x40xf32>
    %17 = tpu.matmul %5, %14, %cst_4 {dimension_numbers = #tpu.dot_dimension_numbers<[1], [0], [0], [1], [0, 0, 1, 1], [], []>} : vector<1x40xf32>, vector<40x40xf32>, vector<1x40xf32> -> vector<1x40xf32>
    %cst_5 = arith.constant 0.000000e+00 : f32
    %18 = vector.broadcast %cst_5 : f32 to vector<40x1xf32>
    %19 = arith.cmpf ogt, %16, %18 : vector<40x1xf32>
    %cst_6 = arith.constant 0.000000e+00 : f32
    %20 = vector.broadcast %cst_6 : f32 to vector<40x1xf32>
    %21 = arith.cmpf ogt, %16, %20 : vector<40x1xf32>
    %cst_7 = arith.constant 1.000000e+00 : f32
    %22 = vector.broadcast %cst_7 : f32 to vector<40x1xf32>
    %23 = arith.select %21, %16, %22 : vector<40x1xi1>, vector<40x1xf32>
    %24 = math.rsqrt %23 : vector<40x1xf32>
    %cst_8 = arith.constant 0.000000e+00 : f32
    %25 = vector.broadcast %cst_8 : f32 to vector<40x1xf32>
    %26 = arith.select %19, %24, %25 : vector<40x1xi1>, vector<40x1xf32>
    %cst_9 = arith.constant 0.000000e+00 : f32
    %27 = vector.broadcast %cst_9 : f32 to vector<1x40xf32>
    %28 = arith.cmpf ogt, %17, %27 : vector<1x40xf32>
    %cst_10 = arith.constant 0.000000e+00 : f32
    %29 = vector.broadcast %cst_10 : f32 to vector<1x40xf32>
    %30 = arith.cmpf ogt, %17, %29 : vector<1x40xf32>
    %cst_11 = arith.constant 1.000000e+00 : f32
    %31 = vector.broadcast %cst_11 : f32 to vector<1x40xf32>
    %32 = arith.select %30, %17, %31 : vector<1x40xi1>, vector<1x40xf32>
    %33 = math.rsqrt %32 : vector<1x40xf32>
    %cst_12 = arith.constant 0.000000e+00 : f32
    %34 = vector.broadcast %cst_12 : f32 to vector<1x40xf32>
    %35 = arith.select %28, %33, %34 : vector<1x40xi1>, vector<1x40xf32>
    %36 = vector.broadcast %26 : vector<40x1xf32> to vector<40x40xf32>
    %37 = arith.mulf %14, %36 : vector<40x40xf32>
    %38 = vector.broadcast %35 : vector<1x40xf32> to vector<40x40xf32>
    %39 = arith.mulf %37, %38 : vector<40x40xf32>
    %c0_13 = arith.constant 0 : index
    %c0_14 = arith.constant 0 : index
    %40 = vector.load %arg1[%c0_13, %c0_14] : memref<144x32xf32, #tpu.memory_space<vmem>>, vector<40x32xf32>
    %cst_15 = arith.constant dense<0.000000e+00> : vector<40x32xf32>
    %41 = tpu.matmul %11, %40, %cst_15 {dimension_numbers = #tpu.dot_dimension_numbers<[1], [0], [0], [1], [0, 0, 1, 1], [], []>} : vector<40x40xf32>, vector<40x32xf32>, vector<40x32xf32> -> vector<40x32xf32>
    %cst_16 = arith.constant dense<0.000000e+00> : vector<40x32xf32>
    %42 = tpu.matmul %39, %41, %cst_16 {dimension_numbers = #tpu.dot_dimension_numbers<[1], [0], [0], [1], [0, 0, 1, 1], [], []>} : vector<40x40xf32>, vector<40x32xf32>, vector<40x32xf32> -> vector<40x32xf32>
    %c40_17 = arith.constant 40 : index
    %c0_18 = arith.constant 0 : index
    %43 = vector.load %arg1[%c40_17, %c0_18] : memref<144x32xf32, #tpu.memory_space<vmem>>, vector<1x32xf32>
    %44 = vector.broadcast %43 : vector<1x32xf32> to vector<40x32xf32>
    %45 = arith.addf %42, %44 : vector<40x32xf32>
    %cst_19 = arith.constant 0.000000e+00 : f32
    %46 = vector.broadcast %cst_19 : f32 to vector<40x32xf32>
    %47 = arith.maximumf %45, %46 : vector<40x32xf32>
    %cst_20 = arith.constant dense<0.000000e+00> : vector<40x40xf32>
    %48 = tpu.matmul %47, %47, %cst_20 {dimension_numbers = #tpu.dot_dimension_numbers<[1], [1], [0], [0], [0, 0, 1, 0], [], []>} : vector<40x32xf32>, vector<40x32xf32>, vector<40x40xf32> -> vector<40x40xf32>
    %cst_21 = arith.constant 0.00999999977 : f32
    %49 = vector.broadcast %cst_21 : f32 to vector<40x40xf32>
    %50 = arith.mulf %49, %48 : vector<40x40xf32>
    %cst_22 = arith.constant dense<0.000000e+00> : vector<40x40xf32>
    %51 = tpu.matmul %48, %48, %cst_22 {dimension_numbers = #tpu.dot_dimension_numbers<[1], [0], [0], [1], [0, 0, 1, 1], [], []>} : vector<40x40xf32>, vector<40x40xf32>, vector<40x40xf32> -> vector<40x40xf32>
    %cst_23 = arith.constant 9.99999974E-5 : f32
    %52 = vector.broadcast %cst_23 : f32 to vector<40x40xf32>
    %53 = arith.mulf %52, %51 : vector<40x40xf32>
    %54 = arith.addf %50, %53 : vector<40x40xf32>
    %cst_24 = arith.constant dense<0x7F800000> : vector<40xf32>
    %55 = vector.multi_reduction <minimumf>, %54, %cst_24 [1] : vector<40x40xf32> to vector<40xf32>
    %56 = vector.shape_cast %55 : vector<40xf32> to vector<40x1xf32>
    %cst_25 = arith.constant dense<0xFF800000> : vector<40xf32>
    %57 = vector.multi_reduction <maximumf>, %54, %cst_25 [1] : vector<40x40xf32> to vector<40xf32>
    %58 = vector.shape_cast %57 : vector<40xf32> to vector<40x1xf32>
    %59 = arith.subf %58, %56 : vector<40x1xf32>
    %60 = vector.broadcast %56 : vector<40x1xf32> to vector<40x40xf32>
    %61 = arith.subf %54, %60 : vector<40x40xf32>
    %cst_26 = arith.constant 0.000000e+00 : f32
    %62 = vector.broadcast %cst_26 : f32 to vector<40x1xf32>
    %63 = arith.cmpf oeq, %59, %62 : vector<40x1xf32>
    %cst_27 = arith.constant 1.000000e+00 : f32
    %64 = vector.broadcast %cst_27 : f32 to vector<40x1xf32>
    %65 = arith.select %63, %64, %59 : vector<40x1xi1>, vector<40x1xf32>
    %66 = vector.broadcast %65 : vector<40x1xf32> to vector<40x40xf32>
    %67 = arith.divf %61, %66 : vector<40x40xf32>
    %cst_28 = arith.constant dense<0.000000e+00> : vector<40x40xf32>
    %68 = tpu.matmul %67, %67, %cst_28 {dimension_numbers = #tpu.dot_dimension_numbers<[1], [1], [0], [0], [0, 0, 1, 0], [], []>} : vector<40x40xf32>, vector<40x40xf32>, vector<40x40xf32> -> vector<40x40xf32>
    %cst_29 = arith.constant 0.000000e+00 : f32
    %69 = vector.broadcast %cst_29 : f32 to vector<40x40xf32>
    %70 = arith.select %2, %68, %69 : vector<40x40xi1>, vector<40x40xf32>
    %cst_30 = arith.constant dense<0.000000e+00> : vector<40xf32>
    %71 = vector.multi_reduction <add>, %70, %cst_30 [1] : vector<40x40xf32> to vector<40xf32>
    %72 = vector.shape_cast %71 : vector<40xf32> to vector<40x1xf32>
    %cst_31 = arith.constant dense<0.000000e+00> : vector<1x40xf32>
    %73 = tpu.matmul %5, %70, %cst_31 {dimension_numbers = #tpu.dot_dimension_numbers<[1], [0], [0], [1], [0, 0, 1, 1], [], []>} : vector<1x40xf32>, vector<40x40xf32>, vector<1x40xf32> -> vector<1x40xf32>
    %74 = arith.mulf %72, %10 : vector<40x1xf32>
    %cst_32 = arith.constant dense<0.000000e+00> : vector<1xf32>
    %75 = vector.multi_reduction <add>, %74, %cst_32 [0] : vector<40x1xf32> to vector<1xf32>
    %76 = vector.shape_cast %75 : vector<1xf32> to vector<1x1xf32>
    %cst_33 = arith.constant dense<0.000000e+00> : vector<1xf32>
    %77 = vector.multi_reduction <add>, %72, %cst_33 [0] : vector<40x1xf32> to vector<1xf32>
    %78 = vector.shape_cast %77 : vector<1xf32> to vector<1x1xf32>
    %79 = arith.subf %78, %76 : vector<1x1xf32>
    %cst_34 = arith.constant 0.000000e+00 : f32
    %80 = vector.broadcast %cst_34 : f32 to vector<1x1xf32>
    %81 = arith.cmpf ogt, %76, %80 : vector<1x1xf32>
    %cst_35 = arith.constant 0.000000e+00 : f32
    %82 = vector.broadcast %cst_35 : f32 to vector<1x1xf32>
    %83 = arith.cmpf ogt, %76, %82 : vector<1x1xf32>
    %cst_36 = arith.constant 1.000000e+00 : f32
    %84 = vector.broadcast %cst_36 : f32 to vector<1x1xf32>
    %85 = arith.select %83, %76, %84 : vector<1x1xi1>, vector<1x1xf32>
    %cst_37 = arith.constant 1.600000e+01 : f32
    %86 = vector.broadcast %cst_37 : f32 to vector<1x1xf32>
    %87 = arith.divf %86, %85 : vector<1x1xf32>
    %cst_38 = arith.constant 1.000000e+00 : f32
    %88 = vector.broadcast %cst_38 : f32 to vector<1x1xf32>
    %89 = arith.select %81, %87, %88 : vector<1x1xi1>, vector<1x1xf32>
    %cst_39 = arith.constant 0.000000e+00 : f32
    %90 = vector.broadcast %cst_39 : f32 to vector<1x1xf32>
    %91 = arith.cmpf ogt, %79, %90 : vector<1x1xf32>
    %cst_40 = arith.constant 0.000000e+00 : f32
    %92 = vector.broadcast %cst_40 : f32 to vector<1x1xf32>
    %93 = arith.cmpf ogt, %79, %92 : vector<1x1xf32>
    %cst_41 = arith.constant 1.000000e+00 : f32
    %94 = vector.broadcast %cst_41 : f32 to vector<1x1xf32>
    %95 = arith.select %93, %79, %94 : vector<1x1xi1>, vector<1x1xf32>
    %cst_42 = arith.constant 2.400000e+01 : f32
    %96 = vector.broadcast %cst_42 : f32 to vector<1x1xf32>
    %97 = arith.divf %96, %95 : vector<1x1xf32>
    %cst_43 = arith.constant 1.000000e+00 : f32
    %98 = vector.broadcast %cst_43 : f32 to vector<1x1xf32>
    %99 = arith.select %91, %97, %98 : vector<1x1xi1>, vector<1x1xf32>
    %100 = vector.broadcast %89 : vector<1x1xf32> to vector<40x1xf32>
    %101 = arith.mulf %10, %100 : vector<40x1xf32>
    %cst_44 = arith.constant 1.000000e+00 : f32
    %102 = vector.broadcast %cst_44 : f32 to vector<40x1xf32>
    %103 = arith.subf %102, %10 : vector<40x1xf32>
    %104 = vector.broadcast %99 : vector<1x1xf32> to vector<40x1xf32>
    %105 = arith.mulf %103, %104 : vector<40x1xf32>
    %106 = arith.addf %101, %105 : vector<40x1xf32>
    %107 = vector.broadcast %72 : vector<40x1xf32> to vector<40x40xf32>
    %108 = vector.broadcast %73 : vector<1x40xf32> to vector<40x40xf32>
    %109 = arith.addf %107, %108 : vector<40x40xf32>
    %cst_45 = arith.constant 2.000000e+00 : f32
    %110 = vector.broadcast %cst_45 : f32 to vector<40x40xf32>
    %111 = arith.mulf %110, %68 : vector<40x40xf32>
    %112 = arith.subf %109, %111 : vector<40x40xf32>
    %cst_46 = arith.constant -1.250000e-01 : f32
    %113 = vector.broadcast %cst_46 : f32 to vector<40x1xf32>
    %114 = arith.mulf %113, %106 : vector<40x1xf32>
    %115 = vector.broadcast %114 : vector<40x1xf32> to vector<40x40xf32>
    %116 = arith.mulf %115, %112 : vector<40x40xf32>
    %117 = math.exp %116 : vector<40x40xf32>
    %118 = arith.addf %13, %117 : vector<40x40xf32>
    %c48 = arith.constant 48 : index
    %c0_47 = arith.constant 0 : index
    %119 = vector.load %arg1[%c48, %c0_47] : memref<144x32xf32, #tpu.memory_space<vmem>>, vector<32x16xf32>
    %cst_48 = arith.constant dense<0.000000e+00> : vector<40x16xf32>
    %120 = tpu.matmul %47, %119, %cst_48 {dimension_numbers = #tpu.dot_dimension_numbers<[1], [0], [0], [1], [0, 0, 1, 1], [], []>} : vector<40x32xf32>, vector<32x16xf32>, vector<40x16xf32> -> vector<40x16xf32>
    %cst_49 = arith.constant dense<0.000000e+00> : vector<40x16xf32>
    %121 = tpu.matmul %39, %120, %cst_49 {dimension_numbers = #tpu.dot_dimension_numbers<[1], [0], [0], [1], [0, 0, 1, 1], [], []>} : vector<40x40xf32>, vector<40x16xf32>, vector<40x16xf32> -> vector<40x16xf32>
    %c80_50 = arith.constant 80 : index
    %c0_51 = arith.constant 0 : index
    %122 = vector.load %arg1[%c80_50, %c0_51] : memref<144x32xf32, #tpu.memory_space<vmem>>, vector<1x16xf32>
    %123 = vector.broadcast %122 : vector<1x16xf32> to vector<40x16xf32>
    %124 = arith.addf %121, %123 : vector<40x16xf32>
    %cst_52 = arith.constant 0.000000e+00 : f32
    %125 = vector.broadcast %cst_52 : f32 to vector<40x16xf32>
    %126 = arith.maximumf %124, %125 : vector<40x16xf32>
    %cst_53 = arith.constant dense<0.000000e+00> : vector<40x40xf32>
    %127 = tpu.matmul %126, %126, %cst_53 {dimension_numbers = #tpu.dot_dimension_numbers<[1], [1], [0], [0], [0, 0, 1, 0], [], []>} : vector<40x16xf32>, vector<40x16xf32>, vector<40x40xf32> -> vector<40x40xf32>
    %cst_54 = arith.constant 0.00999999977 : f32
    %128 = vector.broadcast %cst_54 : f32 to vector<40x40xf32>
    %129 = arith.mulf %128, %127 : vector<40x40xf32>
    %cst_55 = arith.constant dense<0.000000e+00> : vector<40x40xf32>
    %130 = tpu.matmul %127, %127, %cst_55 {dimension_numbers = #tpu.dot_dimension_numbers<[1], [0], [0], [1], [0, 0, 1, 1], [], []>} : vector<40x40xf32>, vector<40x40xf32>, vector<40x40xf32> -> vector<40x40xf32>
    %cst_56 = arith.constant 9.99999974E-5 : f32
    %131 = vector.broadcast %cst_56 : f32 to vector<40x40xf32>
    %132 = arith.mulf %131, %130 : vector<40x40xf32>
    %133 = arith.addf %129, %132 : vector<40x40xf32>
    %cst_57 = arith.constant dense<0x7F800000> : vector<40xf32>
    %134 = vector.multi_reduction <minimumf>, %133, %cst_57 [1] : vector<40x40xf32> to vector<40xf32>
    %135 = vector.shape_cast %134 : vector<40xf32> to vector<40x1xf32>
    %cst_58 = arith.constant dense<0xFF800000> : vector<40xf32>
    %136 = vector.multi_reduction <maximumf>, %133, %cst_58 [1] : vector<40x40xf32> to vector<40xf32>
    %137 = vector.shape_cast %136 : vector<40xf32> to vector<40x1xf32>
    %138 = arith.subf %137, %135 : vector<40x1xf32>
    %139 = vector.broadcast %135 : vector<40x1xf32> to vector<40x40xf32>
    %140 = arith.subf %133, %139 : vector<40x40xf32>
    %cst_59 = arith.constant 0.000000e+00 : f32
    %141 = vector.broadcast %cst_59 : f32 to vector<40x1xf32>
    %142 = arith.cmpf oeq, %138, %141 : vector<40x1xf32>
    %cst_60 = arith.constant 1.000000e+00 : f32
    %143 = vector.broadcast %cst_60 : f32 to vector<40x1xf32>
    %144 = arith.select %142, %143, %138 : vector<40x1xi1>, vector<40x1xf32>
    %145 = vector.broadcast %144 : vector<40x1xf32> to vector<40x40xf32>
    %146 = arith.divf %140, %145 : vector<40x40xf32>
    %cst_61 = arith.constant dense<0.000000e+00> : vector<40x40xf32>
    %147 = tpu.matmul %146, %146, %cst_61 {dimension_numbers = #tpu.dot_dimension_numbers<[1], [1], [0], [0], [0, 0, 1, 0], [], []>} : vector<40x40xf32>, vector<40x40xf32>, vector<40x40xf32> -> vector<40x40xf32>
    %cst_62 = arith.constant 0.000000e+00 : f32
    %148 = vector.broadcast %cst_62 : f32 to vector<40x40xf32>
    %149 = arith.select %2, %147, %148 : vector<40x40xi1>, vector<40x40xf32>
    %cst_63 = arith.constant dense<0.000000e+00> : vector<40xf32>
    %150 = vector.multi_reduction <add>, %149, %cst_63 [1] : vector<40x40xf32> to vector<40xf32>
    %151 = vector.shape_cast %150 : vector<40xf32> to vector<40x1xf32>
    %cst_64 = arith.constant dense<0.000000e+00> : vector<1x40xf32>
    %152 = tpu.matmul %5, %149, %cst_64 {dimension_numbers = #tpu.dot_dimension_numbers<[1], [0], [0], [1], [0, 0, 1, 1], [], []>} : vector<1x40xf32>, vector<40x40xf32>, vector<1x40xf32> -> vector<1x40xf32>
    %153 = arith.mulf %151, %10 : vector<40x1xf32>
    %cst_65 = arith.constant dense<0.000000e+00> : vector<1xf32>
    %154 = vector.multi_reduction <add>, %153, %cst_65 [0] : vector<40x1xf32> to vector<1xf32>
    %155 = vector.shape_cast %154 : vector<1xf32> to vector<1x1xf32>
    %cst_66 = arith.constant dense<0.000000e+00> : vector<1xf32>
    %156 = vector.multi_reduction <add>, %151, %cst_66 [0] : vector<40x1xf32> to vector<1xf32>
    %157 = vector.shape_cast %156 : vector<1xf32> to vector<1x1xf32>
    %158 = arith.subf %157, %155 : vector<1x1xf32>
    %cst_67 = arith.constant 0.000000e+00 : f32
    %159 = vector.broadcast %cst_67 : f32 to vector<1x1xf32>
    %160 = arith.cmpf ogt, %155, %159 : vector<1x1xf32>
    %cst_68 = arith.constant 0.000000e+00 : f32
    %161 = vector.broadcast %cst_68 : f32 to vector<1x1xf32>
    %162 = arith.cmpf ogt, %155, %161 : vector<1x1xf32>
    %cst_69 = arith.constant 1.000000e+00 : f32
    %163 = vector.broadcast %cst_69 : f32 to vector<1x1xf32>
    %164 = arith.select %162, %155, %163 : vector<1x1xi1>, vector<1x1xf32>
    %cst_70 = arith.constant 1.600000e+01 : f32
    %165 = vector.broadcast %cst_70 : f32 to vector<1x1xf32>
    %166 = arith.divf %165, %164 : vector<1x1xf32>
    %cst_71 = arith.constant 1.000000e+00 : f32
    %167 = vector.broadcast %cst_71 : f32 to vector<1x1xf32>
    %168 = arith.select %160, %166, %167 : vector<1x1xi1>, vector<1x1xf32>
    %cst_72 = arith.constant 0.000000e+00 : f32
    %169 = vector.broadcast %cst_72 : f32 to vector<1x1xf32>
    %170 = arith.cmpf ogt, %158, %169 : vector<1x1xf32>
    %cst_73 = arith.constant 0.000000e+00 : f32
    %171 = vector.broadcast %cst_73 : f32 to vector<1x1xf32>
    %172 = arith.cmpf ogt, %158, %171 : vector<1x1xf32>
    %cst_74 = arith.constant 1.000000e+00 : f32
    %173 = vector.broadcast %cst_74 : f32 to vector<1x1xf32>
    %174 = arith.select %172, %158, %173 : vector<1x1xi1>, vector<1x1xf32>
    %cst_75 = arith.constant 2.400000e+01 : f32
    %175 = vector.broadcast %cst_75 : f32 to vector<1x1xf32>
    %176 = arith.divf %175, %174 : vector<1x1xf32>
    %cst_76 = arith.constant 1.000000e+00 : f32
    %177 = vector.broadcast %cst_76 : f32 to vector<1x1xf32>
    %178 = arith.select %170, %176, %177 : vector<1x1xi1>, vector<1x1xf32>
    %179 = vector.broadcast %168 : vector<1x1xf32> to vector<40x1xf32>
    %180 = arith.mulf %10, %179 : vector<40x1xf32>
    %cst_77 = arith.constant 1.000000e+00 : f32
    %181 = vector.broadcast %cst_77 : f32 to vector<40x1xf32>
    %182 = arith.subf %181, %10 : vector<40x1xf32>
    %183 = vector.broadcast %178 : vector<1x1xf32> to vector<40x1xf32>
    %184 = arith.mulf %182, %183 : vector<40x1xf32>
    %185 = arith.addf %180, %184 : vector<40x1xf32>
    %186 = vector.broadcast %151 : vector<40x1xf32> to vector<40x40xf32>
    %187 = vector.broadcast %152 : vector<1x40xf32> to vector<40x40xf32>
    %188 = arith.addf %186, %187 : vector<40x40xf32>
    %cst_78 = arith.constant 2.000000e+00 : f32
    %189 = vector.broadcast %cst_78 : f32 to vector<40x40xf32>
    %190 = arith.mulf %189, %147 : vector<40x40xf32>
    %191 = arith.subf %188, %190 : vector<40x40xf32>
    %cst_79 = arith.constant -1.250000e-01 : f32
    %192 = vector.broadcast %cst_79 : f32 to vector<40x1xf32>
    %193 = arith.mulf %192, %185 : vector<40x1xf32>
    %194 = vector.broadcast %193 : vector<40x1xf32> to vector<40x40xf32>
    %195 = arith.mulf %194, %191 : vector<40x40xf32>
    %196 = math.exp %195 : vector<40x40xf32>
    %197 = arith.addf %118, %196 : vector<40x40xf32>
    %c88 = arith.constant 88 : index
    %c0_80 = arith.constant 0 : index
    %198 = vector.load %arg1[%c88, %c0_80] : memref<144x32xf32, #tpu.memory_space<vmem>>, vector<16x8xf32>
    %cst_81 = arith.constant dense<0.000000e+00> : vector<40x8xf32>
    %199 = tpu.matmul %126, %198, %cst_81 {dimension_numbers = #tpu.dot_dimension_numbers<[1], [0], [0], [1], [0, 0, 1, 1], [], []>} : vector<40x16xf32>, vector<16x8xf32>, vector<40x8xf32> -> vector<40x8xf32>
    %cst_82 = arith.constant dense<0.000000e+00> : vector<40x8xf32>
    %200 = tpu.matmul %39, %199, %cst_82 {dimension_numbers = #tpu.dot_dimension_numbers<[1], [0], [0], [1], [0, 0, 1, 1], [], []>} : vector<40x40xf32>, vector<40x8xf32>, vector<40x8xf32> -> vector<40x8xf32>
    %c104 = arith.constant 104 : index
    %c0_83 = arith.constant 0 : index
    %201 = vector.load %arg1[%c104, %c0_83] : memref<144x32xf32, #tpu.memory_space<vmem>>, vector<1x8xf32>
    %202 = vector.broadcast %201 : vector<1x8xf32> to vector<40x8xf32>
    %203 = arith.addf %200, %202 : vector<40x8xf32>
    %cst_84 = arith.constant 0.000000e+00 : f32
    %204 = vector.broadcast %cst_84 : f32 to vector<40x8xf32>
    %205 = arith.maximumf %203, %204 : vector<40x8xf32>
    %cst_85 = arith.constant dense<0.000000e+00> : vector<40x40xf32>
    %206 = tpu.matmul %205, %205, %cst_85 {dimension_numbers = #tpu.dot_dimension_numbers<[1], [1], [0], [0], [0, 0, 1, 0], [], []>} : vector<40x8xf32>, vector<40x8xf32>, vector<40x40xf32> -> vector<40x40xf32>
    %cst_86 = arith.constant 0.00999999977 : f32
    %207 = vector.broadcast %cst_86 : f32 to vector<40x40xf32>
    %208 = arith.mulf %207, %206 : vector<40x40xf32>
    %cst_87 = arith.constant dense<0.000000e+00> : vector<40x40xf32>
    %209 = tpu.matmul %206, %206, %cst_87 {dimension_numbers = #tpu.dot_dimension_numbers<[1], [0], [0], [1], [0, 0, 1, 1], [], []>} : vector<40x40xf32>, vector<40x40xf32>, vector<40x40xf32> -> vector<40x40xf32>
    %cst_88 = arith.constant 9.99999974E-5 : f32
    %210 = vector.broadcast %cst_88 : f32 to vector<40x40xf32>
    %211 = arith.mulf %210, %209 : vector<40x40xf32>
    %212 = arith.addf %208, %211 : vector<40x40xf32>
    %cst_89 = arith.constant dense<0x7F800000> : vector<40xf32>
    %213 = vector.multi_reduction <minimumf>, %212, %cst_89 [1] : vector<40x40xf32> to vector<40xf32>
    %214 = vector.shape_cast %213 : vector<40xf32> to vector<40x1xf32>
    %cst_90 = arith.constant dense<0xFF800000> : vector<40xf32>
    %215 = vector.multi_reduction <maximumf>, %212, %cst_90 [1] : vector<40x40xf32> to vector<40xf32>
    %216 = vector.shape_cast %215 : vector<40xf32> to vector<40x1xf32>
    %217 = arith.subf %216, %214 : vector<40x1xf32>
    %218 = vector.broadcast %214 : vector<40x1xf32> to vector<40x40xf32>
    %219 = arith.subf %212, %218 : vector<40x40xf32>
    %cst_91 = arith.constant 0.000000e+00 : f32
    %220 = vector.broadcast %cst_91 : f32 to vector<40x1xf32>
    %221 = arith.cmpf oeq, %217, %220 : vector<40x1xf32>
    %cst_92 = arith.constant 1.000000e+00 : f32
    %222 = vector.broadcast %cst_92 : f32 to vector<40x1xf32>
    %223 = arith.select %221, %222, %217 : vector<40x1xi1>, vector<40x1xf32>
    %224 = vector.broadcast %223 : vector<40x1xf32> to vector<40x40xf32>
    %225 = arith.divf %219, %224 : vector<40x40xf32>
    %cst_93 = arith.constant dense<0.000000e+00> : vector<40x40xf32>
    %226 = tpu.matmul %225, %225, %cst_93 {dimension_numbers = #tpu.dot_dimension_numbers<[1], [1], [0], [0], [0, 0, 1, 0], [], []>} : vector<40x40xf32>, vector<40x40xf32>, vector<40x40xf32> -> vector<40x40xf32>
    %cst_94 = arith.constant 0.000000e+00 : f32
    %227 = vector.broadcast %cst_94 : f32 to vector<40x40xf32>
    %228 = arith.select %2, %226, %227 : vector<40x40xi1>, vector<40x40xf32>
    %cst_95 = arith.constant dense<0.000000e+00> : vector<40xf32>
    %229 = vector.multi_reduction <add>, %228, %cst_95 [1] : vector<40x40xf32> to vector<40xf32>
    %230 = vector.shape_cast %229 : vector<40xf32> to vector<40x1xf32>
    %cst_96 = arith.constant dense<0.000000e+00> : vector<1x40xf32>
    %231 = tpu.matmul %5, %228, %cst_96 {dimension_numbers = #tpu.dot_dimension_numbers<[1], [0], [0], [1], [0, 0, 1, 1], [], []>} : vector<1x40xf32>, vector<40x40xf32>, vector<1x40xf32> -> vector<1x40xf32>
    %232 = arith.mulf %230, %10 : vector<40x1xf32>
    %cst_97 = arith.constant dense<0.000000e+00> : vector<1xf32>
    %233 = vector.multi_reduction <add>, %232, %cst_97 [0] : vector<40x1xf32> to vector<1xf32>
    %234 = vector.shape_cast %233 : vector<1xf32> to vector<1x1xf32>
    %cst_98 = arith.constant dense<0.000000e+00> : vector<1xf32>
    %235 = vector.multi_reduction <add>, %230, %cst_98 [0] : vector<40x1xf32> to vector<1xf32>
    %236 = vector.shape_cast %235 : vector<1xf32> to vector<1x1xf32>
    %237 = arith.subf %236, %234 : vector<1x1xf32>
    %cst_99 = arith.constant 0.000000e+00 : f32
    %238 = vector.broadcast %cst_99 : f32 to vector<1x1xf32>
    %239 = arith.cmpf ogt, %234, %238 : vector<1x1xf32>
    %cst_100 = arith.constant 0.000000e+00 : f32
    %240 = vector.broadcast %cst_100 : f32 to vector<1x1xf32>
    %241 = arith.cmpf ogt, %234, %240 : vector<1x1xf32>
    %cst_101 = arith.constant 1.000000e+00 : f32
    %242 = vector.broadcast %cst_101 : f32 to vector<1x1xf32>
    %243 = arith.select %241, %234, %242 : vector<1x1xi1>, vector<1x1xf32>
    %cst_102 = arith.constant 1.600000e+01 : f32
    %244 = vector.broadcast %cst_102 : f32 to vector<1x1xf32>
    %245 = arith.divf %244, %243 : vector<1x1xf32>
    %cst_103 = arith.constant 1.000000e+00 : f32
    %246 = vector.broadcast %cst_103 : f32 to vector<1x1xf32>
    %247 = arith.select %239, %245, %246 : vector<1x1xi1>, vector<1x1xf32>
    %cst_104 = arith.constant 0.000000e+00 : f32
    %248 = vector.broadcast %cst_104 : f32 to vector<1x1xf32>
    %249 = arith.cmpf ogt, %237, %248 : vector<1x1xf32>
    %cst_105 = arith.constant 0.000000e+00 : f32
    %250 = vector.broadcast %cst_105 : f32 to vector<1x1xf32>
    %251 = arith.cmpf ogt, %237, %250 : vector<1x1xf32>
    %cst_106 = arith.constant 1.000000e+00 : f32
    %252 = vector.broadcast %cst_106 : f32 to vector<1x1xf32>
    %253 = arith.select %251, %237, %252 : vector<1x1xi1>, vector<1x1xf32>
    %cst_107 = arith.constant 2.400000e+01 : f32
    %254 = vector.broadcast %cst_107 : f32 to vector<1x1xf32>
    %255 = arith.divf %254, %253 : vector<1x1xf32>
    %cst_108 = arith.constant 1.000000e+00 : f32
    %256 = vector.broadcast %cst_108 : f32 to vector<1x1xf32>
    %257 = arith.select %249, %255, %256 : vector<1x1xi1>, vector<1x1xf32>
    %258 = vector.broadcast %247 : vector<1x1xf32> to vector<40x1xf32>
    %259 = arith.mulf %10, %258 : vector<40x1xf32>
    %cst_109 = arith.constant 1.000000e+00 : f32
    %260 = vector.broadcast %cst_109 : f32 to vector<40x1xf32>
    %261 = arith.subf %260, %10 : vector<40x1xf32>
    %262 = vector.broadcast %257 : vector<1x1xf32> to vector<40x1xf32>
    %263 = arith.mulf %261, %262 : vector<40x1xf32>
    %264 = arith.addf %259, %263 : vector<40x1xf32>
    %265 = vector.broadcast %230 : vector<40x1xf32> to vector<40x40xf32>
    %266 = vector.broadcast %231 : vector<1x40xf32> to vector<40x40xf32>
    %267 = arith.addf %265, %266 : vector<40x40xf32>
    %cst_110 = arith.constant 2.000000e+00 : f32
    %268 = vector.broadcast %cst_110 : f32 to vector<40x40xf32>
    %269 = arith.mulf %268, %226 : vector<40x40xf32>
    %270 = arith.subf %267, %269 : vector<40x40xf32>
    %cst_111 = arith.constant -1.250000e-01 : f32
    %271 = vector.broadcast %cst_111 : f32 to vector<40x1xf32>
    %272 = arith.mulf %271, %264 : vector<40x1xf32>
    %273 = vector.broadcast %272 : vector<40x1xf32> to vector<40x40xf32>
    %274 = arith.mulf %273, %270 : vector<40x40xf32>
    %275 = math.exp %274 : vector<40x40xf32>
    %276 = arith.addf %197, %275 : vector<40x40xf32>
    %277 = vector.extract_strided_slice %276 {offsets = [0, 0], sizes = [16, 16], strides = [1, 1]} : vector<40x40xf32> to vector<16x16xf32>
    %cst_112 = arith.constant 2.500000e-01 : f32
    %278 = vector.broadcast %cst_112 : f32 to vector<16x16xf32>
    %279 = arith.mulf %278, %277 : vector<16x16xf32>
    %280 = math.absf %279 : vector<16x16xf32>
    %cst_113 = arith.constant 0.000000e+00 : f32
    %281 = vector.broadcast %cst_113 : f32 to vector<16x16xf32>
    %282 = arith.cmpf ogt, %280, %281 : vector<16x16xf32>
    %cst_114 = arith.constant 0x7F800000 : f32
    %283 = vector.broadcast %cst_114 : f32 to vector<16x16xf32>
    %284 = arith.select %282, %280, %283 : vector<16x16xi1>, vector<16x16xf32>
    %cst_115 = arith.constant dense<0x7F800000> : vector<16xf32>
    %285 = vector.multi_reduction <minimumf>, %284, %cst_115 [1] : vector<16x16xf32> to vector<16xf32>
    %286 = vector.shape_cast %285 : vector<16xf32> to vector<16x1xf32>
    %cst_116 = arith.constant dense<0x7F800000> : vector<1xf32>
    %287 = vector.multi_reduction <minimumf>, %286, %cst_116 [0] : vector<16x1xf32> to vector<1xf32>
    %288 = vector.shape_cast %287 : vector<1xf32> to vector<1x1xf32>
    %289 = tpu.weird %288 : vector<1x1xf32> -> vector<1x1xi1>
    %cst_117 = arith.constant dense<true> : vector<1x1xi1>
    %290 = arith.xori %289, %cst_117 : vector<1x1xi1>
    %cst_118 = arith.constant 1.000000e+00 : f32
    %291 = vector.broadcast %cst_118 : f32 to vector<1x1xf32>
    %292 = arith.select %290, %288, %291 : vector<1x1xi1>, vector<1x1xf32>
    %cst_119 = arith.constant 0.000000e+00 : f32
    %293 = vector.broadcast %cst_119 : f32 to vector<16x16xf32>
    %294 = arith.cmpf oeq, %280, %293 : vector<16x16xf32>
    %295 = vector.shape_cast %292 : vector<1x1xf32> to vector<1x1xf32>
    %296 = vector.broadcast %295 : vector<1x1xf32> to vector<16x16xf32>
    %297 = arith.select %294, %296, %280 : vector<16x16xi1>, vector<16x16xf32>
    %298 = tpu.iota {dimensions = array<i32: 0>} : vector<16x16xi32>
    %299 = tpu.iota {dimensions = array<i32: 1>} : vector<16x16xi32>
    %300 = arith.cmpi eq, %298, %299 : vector<16x16xi32>
    %cst_120 = arith.constant 0.000000e+00 : f32
    %301 = vector.broadcast %cst_120 : f32 to vector<16x16xf32>
    %302 = arith.select %300, %297, %301 : vector<16x16xi1>, vector<16x16xf32>
    %cst_121 = arith.constant dense<0.000000e+00> : vector<16xf32>
    %303 = vector.multi_reduction <add>, %302, %cst_121 [1] : vector<16x16xf32> to vector<16xf32>
    %304 = vector.shape_cast %303 : vector<16xf32> to vector<16x1xf32>
    %cst_122 = arith.constant 1.000000e+00 : f32
    %305 = vector.broadcast %cst_122 : f32 to vector<1x16xf32>
    %cst_123 = arith.constant dense<0.000000e+00> : vector<1x16xf32>
    %306 = tpu.matmul %305, %302, %cst_123 {dimension_numbers = #tpu.dot_dimension_numbers<[1], [0], [0], [1], [0, 0, 1, 1], [], []>} : vector<1x16xf32>, vector<16x16xf32>, vector<1x16xf32> -> vector<1x16xf32>
    %307 = vector.broadcast %304 : vector<16x1xf32> to vector<16x16xf32>
    %308 = vector.broadcast %306 : vector<1x16xf32> to vector<16x16xf32>
    %309 = arith.mulf %307, %308 : vector<16x16xf32>
    %cst_124 = arith.constant 0.000000e+00 : f32
    %310 = vector.broadcast %cst_124 : f32 to vector<16x16xf32>
    %311 = arith.cmpf ogt, %309, %310 : vector<16x16xf32>
    %cst_125 = arith.constant 1.000000e+00 : f32
    %312 = vector.broadcast %cst_125 : f32 to vector<16x16xf32>
    %313 = arith.select %311, %309, %312 : vector<16x16xi1>, vector<16x16xf32>
    %cst_126 = arith.constant 0.000000e+00 : f32
    %314 = vector.broadcast %cst_126 : f32 to vector<16x16xf32>
    %315 = arith.cmpf ogt, %309, %314 : vector<16x16xf32>
    %316 = math.rsqrt %313 : vector<16x16xf32>
    %cst_127 = arith.constant 0.000000e+00 : f32
    %317 = vector.broadcast %cst_127 : f32 to vector<16x16xf32>
    %318 = arith.select %315, %316, %317 : vector<16x16xi1>, vector<16x16xf32>
    %319 = arith.mulf %297, %318 : vector<16x16xf32>
    %320 = vector.extract_strided_slice %276 {offsets = [16, 16], sizes = [24, 24], strides = [1, 1]} : vector<40x40xf32> to vector<24x24xf32>
    %cst_128 = arith.constant 2.500000e-01 : f32
    %321 = vector.broadcast %cst_128 : f32 to vector<24x24xf32>
    %322 = arith.mulf %321, %320 : vector<24x24xf32>
    %323 = math.absf %322 : vector<24x24xf32>
    %cst_129 = arith.constant 0.000000e+00 : f32
    %324 = vector.broadcast %cst_129 : f32 to vector<24x24xf32>
    %325 = arith.cmpf ogt, %323, %324 : vector<24x24xf32>
    %cst_130 = arith.constant 0x7F800000 : f32
    %326 = vector.broadcast %cst_130 : f32 to vector<24x24xf32>
    %327 = arith.select %325, %323, %326 : vector<24x24xi1>, vector<24x24xf32>
    %cst_131 = arith.constant dense<0x7F800000> : vector<24xf32>
    %328 = vector.multi_reduction <minimumf>, %327, %cst_131 [1] : vector<24x24xf32> to vector<24xf32>
    %329 = vector.shape_cast %328 : vector<24xf32> to vector<24x1xf32>
    %cst_132 = arith.constant dense<0x7F800000> : vector<1xf32>
    %330 = vector.multi_reduction <minimumf>, %329, %cst_132 [0] : vector<24x1xf32> to vector<1xf32>
    %331 = vector.shape_cast %330 : vector<1xf32> to vector<1x1xf32>
    %332 = tpu.weird %331 : vector<1x1xf32> -> vector<1x1xi1>
    %cst_133 = arith.constant dense<true> : vector<1x1xi1>
    %333 = arith.xori %332, %cst_133 : vector<1x1xi1>
    %cst_134 = arith.constant 1.000000e+00 : f32
    %334 = vector.broadcast %cst_134 : f32 to vector<1x1xf32>
    %335 = arith.select %333, %331, %334 : vector<1x1xi1>, vector<1x1xf32>
    %cst_135 = arith.constant 0.000000e+00 : f32
    %336 = vector.broadcast %cst_135 : f32 to vector<24x24xf32>
    %337 = arith.cmpf oeq, %323, %336 : vector<24x24xf32>
    %338 = vector.shape_cast %335 : vector<1x1xf32> to vector<1x1xf32>
    %339 = vector.broadcast %338 : vector<1x1xf32> to vector<24x24xf32>
    %340 = arith.select %337, %339, %323 : vector<24x24xi1>, vector<24x24xf32>
    %341 = tpu.iota {dimensions = array<i32: 0>} : vector<24x24xi32>
    %342 = tpu.iota {dimensions = array<i32: 1>} : vector<24x24xi32>
    %343 = arith.cmpi eq, %341, %342 : vector<24x24xi32>
    %cst_136 = arith.constant 0.000000e+00 : f32
    %344 = vector.broadcast %cst_136 : f32 to vector<24x24xf32>
    %345 = arith.select %343, %340, %344 : vector<24x24xi1>, vector<24x24xf32>
    %cst_137 = arith.constant dense<0.000000e+00> : vector<24xf32>
    %346 = vector.multi_reduction <add>, %345, %cst_137 [1] : vector<24x24xf32> to vector<24xf32>
    %347 = vector.shape_cast %346 : vector<24xf32> to vector<24x1xf32>
    %cst_138 = arith.constant 1.000000e+00 : f32
    %348 = vector.broadcast %cst_138 : f32 to vector<1x24xf32>
    %cst_139 = arith.constant dense<0.000000e+00> : vector<1x24xf32>
    %349 = tpu.matmul %348, %345, %cst_139 {dimension_numbers = #tpu.dot_dimension_numbers<[1], [0], [0], [1], [0, 0, 1, 1], [], []>} : vector<1x24xf32>, vector<24x24xf32>, vector<1x24xf32> -> vector<1x24xf32>
    %350 = vector.broadcast %347 : vector<24x1xf32> to vector<24x24xf32>
    %351 = vector.broadcast %349 : vector<1x24xf32> to vector<24x24xf32>
    %352 = arith.mulf %350, %351 : vector<24x24xf32>
    %cst_140 = arith.constant 0.000000e+00 : f32
    %353 = vector.broadcast %cst_140 : f32 to vector<24x24xf32>
    %354 = arith.cmpf ogt, %352, %353 : vector<24x24xf32>
    %cst_141 = arith.constant 1.000000e+00 : f32
    %355 = vector.broadcast %cst_141 : f32 to vector<24x24xf32>
    %356 = arith.select %354, %352, %355 : vector<24x24xi1>, vector<24x24xf32>
    %cst_142 = arith.constant 0.000000e+00 : f32
    %357 = vector.broadcast %cst_142 : f32 to vector<24x24xf32>
    %358 = arith.cmpf ogt, %352, %357 : vector<24x24xf32>
    %359 = math.rsqrt %356 : vector<24x24xf32>
    %cst_143 = arith.constant 0.000000e+00 : f32
    %360 = vector.broadcast %cst_143 : f32 to vector<24x24xf32>
    %361 = arith.select %358, %359, %360 : vector<24x24xi1>, vector<24x24xf32>
    %362 = arith.mulf %340, %361 : vector<24x24xf32>
    %c128 = arith.constant 128 : index
    %c0_144 = arith.constant 0 : index
    %363 = vector.load %arg1[%c128, %c0_144] : memref<144x32xf32, #tpu.memory_space<vmem>>, vector<16x24xf32>
    %364 = tpu.concatenate %319, %363 in 1 : vector<16x16xf32>, vector<16x24xf32> -> vector<16x40xf32>
    %c112 = arith.constant 112 : index
    %c0_145 = arith.constant 0 : index
    %365 = vector.load %arg1[%c112, %c0_145] : memref<144x32xf32, #tpu.memory_space<vmem>>, vector<16x24xf32>
    %366 = tpu.concatenate %365, %362 in 0 : vector<16x24xf32>, vector<24x24xf32> -> vector<40x24xf32>
    %cst_146 = arith.constant dense<0.000000e+00> : vector<16x24xf32>
    %367 = tpu.matmul %364, %366, %cst_146 {dimension_numbers = #tpu.dot_dimension_numbers<[1], [0], [0], [1], [0, 0, 1, 1], [], []>} : vector<16x40xf32>, vector<40x24xf32>, vector<16x24xf32> -> vector<16x24xf32>
    %cst_147 = arith.constant 5.000000e-01 : f32
    %368 = vector.broadcast %cst_147 : f32 to vector<16x24xf32>
    %369 = arith.mulf %368, %367 : vector<16x24xf32>
    %c0_148 = arith.constant 0 : index
    %c0_149 = arith.constant 0 : index
    %370 = vector.load %arg2[%c0_148, %c0_149] : memref<16x24xf32, #tpu.memory_space<vmem>>, vector<16x24xf32>
    tpu.vector_store %arg2[%c0_148, %c0_149], %369 {strides = array<i32>} : memref<16x24xf32, #tpu.memory_space<vmem>>, vector<16x24xf32>,
    return
  }
}

</mosaic_0001>

<bundles_post_ra>
// kernel: tpu_custom_call.1
= control target key start
LH: loop header
LB: loop body
LE: loop exit
PB: predicated region body
PF: predicated region fallthrough
CT: control target
= control target key end

     0   :  { %v12_v1 = vlaneseq  ;;  %v3860_v2 = vmov 0.0   ;;  %vm3861_vm0 = vmmov 0   ;;  %s4986_s0 = inlined_call_operand.vmem [shape: f32[120,40], index: 0, kind: input, shape index: {}]   ;;  %s4987_s1 = inlined_call_operand.vmem [shape: f32[144,32], index: 1, kind: input, shape index: {}]   ;;  %s4988_s2 = inlined_call_operand.hbm [shape: f32[16,24], index: 2, kind: output, shape index: {}]  }
   0x1   :  { %v201_v0 = vld [vmem:[%s4987_s1 + $0x20] sm:$0xff]  ;;  %3300 = vmatprep.subr.mxu1 %v3860_v2  ;;  %v200_v3 = vld [vmem:[%s4987_s1 + $0x18] sm:$0xff]  ;;  %3287 = vmatprep.subr.mxu0 %v3860_v2  ;;  %v199_v6 = vld [vmem:[%s4987_s1 + $0x10] sm:$0xff] }
   0x2   :  { %3301 = vmatpush3.msra.mxu1 %v201_v0  ;;  %v3892_v4 = vshrl.u32 %v12_v1, 7  ;;  %v19_v5 = vand.u32 127, %v12_v1  ;;  %3310 = vmatprep.mubr.msk.f32.mxu1 %vm3861_vm0, %v3860_v2  ;;  %v198_v7 = vld [vmem:[%s4987_s1 + $0x8] sm:$0xff]  ;;  %v58_v13 = vld [vmem:[%s4986_s0 + $0x40] sm:$0xff] }
   0x3   :  { %3302 = vmatprep.subr.mxu1 %v3860_v2  ;;  %3297 = vmatprep.mubr.msk.f32.mxu0 %vm3861_vm0, %v3860_v2  ;;  %v59_v12 = vld [vmem:[%s4986_s0 + $0x48] sm:$0xff] }
   0x4   :  { %3303 = vmatpush3.msra.mxu1 %v200_v3  ;;  %v17_v8 = vadd.s32 32, %v3892_v4  ;;  %v16_v9 = vadd.s32 24, %v3892_v4  ;;  %v15_v10 = vadd.s32 16, %v3892_v4  ;;  %v14_v11 = vadd.s32 8, %v3892_v4 }
   0x5   :  { %3304 = vmatprep.subr.mxu1 %v3860_v2  ;;  %vm3917_vm1 = vcmp.eq.s32.totalorder %v3892_v4, %v19_v5 }
   0x6   :  { %7 = vsyncpa [#allocation3], 0  ;;  %3305 = vmatpush3.msra.mxu1 %v199_v6  ;;  %vm3921_vm2 = vcmp.eq.s32.totalorder %v17_v8, %v19_v5  ;;  %vm3925_vm3 = vcmp.eq.s32.totalorder %v16_v9, %v19_v5  ;;  %vm3929_vm4 = vcmp.eq.s32.totalorder %v15_v10, %v19_v5  ;;  %v57_v18 = vld [vmem:[%s4986_s0 + $0x38] sm:$0xff]  ;;  %vm3936_vm5 = vcmp.eq.s32.totalorder %v14_v11, %v19_v5  ;;  %v197_v21 = vld [vmem:[%s4987_s1] sm:$0xff]  ;;  %s3865_s11 = smov 16  }
   0x7   :  { %3306 = vmatprep.subr.mxu1 %v3860_v2  ;;  %v2966_v20 = vsel %vm3921_vm2, 1.0, %v3860_v2  ;;  %v2965_v22 = vsel %vm3925_vm3, 1.0, %v3860_v2  ;;  %v2964_v23 = vsel %vm3929_vm4, 1.0, %v3860_v2  ;;  %v55_v24 = vld [vmem:[%s4986_s0 + $0x28] sm:$0xff]  ;;  %v50_v26 = vld [vmem:[%s4986_s0] sm:$0xff]  ;;  %vm70_vm6 = vcmask 326656  }
   0x8   :  { %3307 = vmatpush3.msra.mxu1 %v198_v7  ;;  %v3956_v25 = vadd.f32 %v2966_v20, %v59_v12  ;;  %v3961_v27 = vadd.f32 %v2965_v22, %v58_v13  ;;  %v3964_v28 = vadd.f32 %v2964_v23, %v57_v18  ;;  %v2963_v29 = vsel %vm3936_vm5, 1.0, %v3860_v2  ;;  %v56_v30 = vld [vmem:[%s4986_s0 + $0x30] sm:$0xff]  ;;  %v51_v34 = vld [vmem:[%s4986_s0 + $0x8] sm:$0xff]  ;;  %v53_v42 = vld [vmem:[%s4986_s0 + $0x18] sm:$0xff] }
   0x9   :  { %3308 = vmatprep.subr.mxu1 %v3860_v2  ;;  %v2962_v31 = vsel %vm3917_vm1, 1.0, %v3860_v2  ;;  %v3988_v35 = vadd.f32 %v2963_v29, %v56_v30  ;;  %v52_v39 = vld [vmem:[%s4986_s0 + $0x10] sm:$0xff]  ;;  %v3862_v41 = vmov 1.0   ;;  %v54_v43 = vld [vmem:[%s4986_s0 + $0x20] sm:$0xff]  ;;  %v4040_v6 = vsub.s32 0, %v3892_v4  ;;  %v2836_v14 = vld [vmem:[%s4987_s1 + $0x88] sm:$0xff] }
   0xa   :  { %3288 = vmatpush3.msra.mxu0 %v3956_v25  ;;  %3309 = vmatpush3.msra.mxu1 %v197_v21  ;;  %v3976_v32 = vadd.f32 %v2962_v31, %v55_v24  ;;  %v77_v33 = vsel %vm70_vm6, %v3964_v28, 0.0  ;;  %v80_v38 = vsel %vm70_vm6, %v3961_v27, 0.0  ;;  %v83_v40 = vsel %vm70_vm6, %v3956_v25, 0.0 }
   0xb   :  { %3289 = vmatprep.subr.mxu0 %v3860_v2  ;;  %3311 = vmatmul.mubr.msk.f32.vlgmr.msra.gmra.mxu1 %vm70_vm6, %v50_v26  ;;  %v74_v37 = vsel %vm70_vm6, %v3988_v35, 0.0  ;;  %vm422_vm13 = vcmask 261120  }
   0xc   :  { %3290 = vmatpush3.msra.mxu0 %v3961_v27  ;;  %3313 = vmatprep.mubr.msk.f32.mxu1 %vm3861_vm0, %v3860_v2  ;;  %v71_v36 = vsel %vm70_vm6, %v3976_v32, 0.0 }
   0xd   :  { %3291 = vmatprep.subr.mxu0 %v3860_v2  ;;  %72 = vadd.xlane.f32.xlu0 %v71_v36 }
   0xe   :  { %3292 = vmatpush3.msra.mxu0 %v3964_v28  ;;  %78 = vadd.xlane.f32.xlu1 %v77_v33 }
   0xf   :  { %3293 = vmatprep.subr.mxu0 %v3860_v2  ;;  %3314 = vmatmul.mubr.msk.f32.gmra.mxu1 %vm70_vm6, %v51_v34 }
  0x10   :  { %3294 = vmatpush3.msra.mxu0 %v3988_v35  ;;  %3316 = vmatprep.mubr.msk.f32.mxu1 %vm3861_vm0, %v3860_v2 }
  0x11   :  { %3295 = vmatprep.subr.mxu0 %v3860_v2  ;;  %75 = vadd.xlane.f32.xlu0 %v74_v37 }
  0x12   :  { %3296 = vmatpush3.msra.mxu0 %v3976_v32  ;;  %81 = vadd.xlane.f32.xlu1 %v80_v38 }
  0x13   :  { %3298 = vmatmul.mubr.msk.f32.vlgmr.msra.gmra.mxu0 %vm70_vm6, %v3862_v41  ;;  %3317 = vmatmul.mubr.msk.f32.gmra.mxu1 %vm70_vm6, %v52_v39 }
  0x14   :  { %3319 = vmatprep.mubr.msk.f32.mxu1 %vm3861_vm0, %v3860_v2  ;;  %3325 = vmatprep.subr.mxu0 %v3860_v2 }
  0x15   :  { %84 = vadd.xlane.f32.xlu0 %v83_v40  ;;  %3335 = vmatprep.mubr.msk.f32.mxu0 %vm3861_vm0, %v3860_v2 }
  0x16   :  { %3350 = vmatprep.subr.mxu1 %v3860_v2 }
  0x17   :  { %3320 = vmatmul.mubr.msk.f32.gmra.mxu1 %vm70_vm6, %v53_v42  ;;  %v2973_v42 = vld [vmem:[%s4987_s1 + $0x28] ss:$0 sm:$0xff] }
  0x18   :  { %3322 = vmatprep.mubr.msk.f32.mxu1 %vm3861_vm0, %v3860_v2 }
  0x1b   :  { %3323 = vmatmul.mubr.msk.f32.gmra.mxu1 %vm70_vm6, %v54_v43 }
  0x1c   :  { %3360 = vmatprep.mubr.msk.f32.mxu1 %vm3861_vm0, %v3860_v2 }
  0x96   :  { %v73_v44 = vpop.xlane.xlu0 %72 }
  0x97   :  { %vm159_vm7 = vcmp.gt.f32.partialorder %v73_v44, 0.0  ;;  %v79_v48 = vpop.xlane.xlu1 %78 }
  0x98   :  { %v164_v49 = vsel %vm159_vm7, %v73_v44, 1.0  ;;  %vm161_vm9 = vcmp.gt.f32.partialorder %v79_v48, 0.0 }
  0x99   :  { %3744 = vrsqrt.f32 %v164_v49  ;;  %v166_v59 = vsel %vm161_vm9, %v79_v48, 1.0 }
  0x9a   :  { %v76_v46 = vpop.xlane.xlu0 %75 }
  0x9b   :  { %vm160_vm8 = vcmp.gt.f32.partialorder %v76_v46, 0.0  ;;  %v82_v55 = vpop.xlane.xlu1 %81 }
  0x9c   :  { %v165_v52 = vsel %vm160_vm8, %v76_v46, 1.0  ;;  %vm162_vm11 = vcmp.gt.f32.partialorder %v82_v55, 0.0 }
  0x9d   :  { %3746 = vrsqrt.f32 %v165_v52  ;;  %v167_v63 = vsel %vm162_vm11, %v82_v55, 1.0 }
  0x9e   :  { %v85_v60 = vpop.xlane.xlu0 %84 }
  0x9f   :  { %vm163_vm12 = vcmp.gt.f32.partialorder %v85_v60, 0.0 }
  0xa0   :  { %v168_v1 = vsel %vm163_vm12, %v85_v60, 1.0 }
  0xa6   :  { %v3745_v5 = vpop.eup %3744 }
  0xa7   :  { %v174_v8 = vsel %vm159_vm7, %v3745_v5, 0.0 }
  0xa8   :  { %v183_v11 = vmul.f32 %v174_v8, %v3976_v32 }
  0xaa   :  { %v3747_v7 = vpop.eup %3746 }
  0xab   :  { %v175_v4 = vsel %vm160_vm8, %v3747_v7, 0.0 }
  0xac   :  { %v184_v20 = vmul.f32 %v175_v4, %v3988_v35 }
  0xcb   :  { %v283_v45 = vpop.f32.mrf.mxu1 }
  0xcd   :  { %v3312_v47 = vpop.f32.mrf.mxu1 }
  0xcf   :  { %v288_v50 = vpop.f32.mrf.mxu1 }
  0xd1   :  { %v3315_v51 = vpop.f32.mrf.mxu1 }
  0xd3   :  { %v155_v53 = vpop.f32.mrf.mxu0  ;;  %v293_v54 = vpop.f32.mrf.mxu1 }
  0xd4   :  { %vm179_vm10 = vcmp.gt.f32.partialorder %v155_v53, 0.0 }
  0xd5   :  { %v180_v56 = vsel %vm179_vm10, %v155_v53, 1.0  ;;  %v3299_v57 = vpop.f32.mrf.mxu0  ;;  %v3318_v58 = vpop.f32.mrf.mxu1 }
  0xd6   :  { %3748 = vrsqrt.f32 %v180_v56 }
  0xd7   :  { %v298_v61 = vpop.f32.mrf.mxu1  ;;  %3750 = vrsqrt.f32 %v166_v59 }
  0xd8   :  { %3752 = vrsqrt.f32 %v167_v63 }
  0xd9   :  { %v3321_v62 = vpop.f32.mrf.mxu1  ;;  %3754 = vrsqrt.f32 %v168_v1 }
  0xdb   :  { %v303_v0 = vpop.f32.mrf.mxu1 }
  0xdc   :  { %3326 = vmatpush3.msra.mxu0 %v303_v0 }
  0xdd   :  { %3327 = vmatprep.subr.mxu0 %v3860_v2  ;;  %v3324_v3 = vpop.f32.mrf.mxu1 }
  0xde   :  { %3328 = vmatpush3.msra.mxu0 %v298_v61 }
  0xdf   :  { %3329 = vmatprep.subr.mxu0 %v3860_v2 }
  0xe0   :  { %3330 = vmatpush3.msra.mxu0 %v293_v54 }
  0xe1   :  { %3331 = vmatprep.subr.mxu0 %v3860_v2 }
  0xe2   :  { %3332 = vmatpush3.msra.mxu0 %v288_v50 }
  0xe3   :  { %v3749_v9 = vpop.eup %3748  ;;  %3333 = vmatprep.subr.mxu0 %v3860_v2 }
  0xe4   :  { %v182_v10 = vsel %vm179_vm10, %v3749_v9, 0.0  ;;  %3334 = vmatpush3.msra.mxu0 %v283_v45  ;;  %v3751_v13 = vpop.eup %3750  ;;  %vm1197_vm10 = vcmask 130048  }
  0xe5   :  { %v191_v12 = vrot.slane %v182_v10, %v4040_v6  ;;  %3375 = vmatprep.subr.mxu0 %v3860_v2  ;;  %v176_v21 = vsel %vm161_vm9, %v3751_v13, 0.0  ;;  %v3753_v22 = vpop.eup %3752 }
  0xe6   :  { %v3755_v24 = vpop.eup %3754  ;;  %v185_v26 = vmul.f32 %v176_v21, %v3964_v28  ;;  %v177_v29 = vsel %vm162_vm11, %v3753_v22, 0.0 }
  0xe7   :  { %v4050_v18 = vmul.f32 %v191_v12, %v183_v11  ;;  %v4058_v23 = vmul.f32 %v191_v12, %v184_v20  ;;  %v178_v31 = vsel %vm163_vm12, %v3755_v24, 0.0  ;;  %v186_v32 = vmul.f32 %v177_v29, %v3961_v27 }
  0xe8   :  { %v4066_v30 = vmul.f32 %v191_v12, %v185_v26  ;;  %v187_v28 = vmul.f32 %v178_v31, %v3956_v25 }
  0xe9   :  { %3336 = vmatmul.mubr.msk.f32.vlgmr.msra.gmra.mxu0 %vm70_vm6, %v4050_v18  ;;  %v4075_v33 = vmul.f32 %v191_v12, %v186_v32 }
  0xea   :  { %3338 = vmatprep.mubr.msk.f32.mxu0 %vm3861_vm0, %v3860_v2  ;;  %v4081_v34 = vmul.f32 %v191_v12, %v187_v28 }
  0xed   :  { %3339 = vmatmul.mubr.msk.f32.gmra.mxu0 %vm70_vm6, %v4058_v23 }
  0xee   :  { %3341 = vmatprep.mubr.msk.f32.mxu0 %vm3861_vm0, %v3860_v2 }
  0xf1   :  { %3342 = vmatmul.mubr.msk.f32.gmra.mxu0 %vm70_vm6, %v4066_v30 }
  0xf2   :  { %3344 = vmatprep.mubr.msk.f32.mxu0 %vm3861_vm0, %v3860_v2 }
  0xf5   :  { %3345 = vmatmul.mubr.msk.f32.gmra.mxu0 %vm70_vm6, %v4075_v33 }
  0xf6   :  { %3347 = vmatprep.mubr.msk.f32.mxu0 %vm3861_vm0, %v3860_v2 }
  0xf9   :  { %3348 = vmatmul.mubr.msk.f32.gmra.mxu0 %vm70_vm6, %v4081_v34 }
  0xfa   :  { %3385 = vmatprep.mubr.msk.f32.mxu0 %vm3861_vm0, %v3860_v2 }
 0x1a9   :  { %v393_v27 = vpop.f32.mrf.mxu0 }
 0x1aa   :  { %v394_v52 = vadd.f32 %v2973_v42, %v393_v27 }
 0x1ab   :  { %v3337_v35 = vpop.f32.mrf.mxu0 }
 0x1ac   :  { %v4110_v54 = vmax.f32 %v394_v52, 0.0 }
 0x1ad   :  { %v398_v36 = vpop.f32.mrf.mxu0 }
 0x1ae   :  { %v399_v50 = vadd.f32 %v2973_v42, %v398_v36 }
 0x1af   :  { %v3340_v25 = vpop.f32.mrf.mxu0 }
 0x1b0   :  { %v4105_v53 = vmax.f32 %v399_v50, 0.0 }
 0x1b1   :  { %v403_v37 = vpop.f32.mrf.mxu0 }
 0x1b2   :  { %v404_v48 = vadd.f32 %v2973_v42, %v403_v37 }
 0x1b3   :  { %v3343_v38 = vpop.f32.mrf.mxu0 }
 0x1b4   :  { %v4100_v51 = vmax.f32 %v404_v48, 0.0 }
 0x1b5   :  { %v408_v39 = vpop.f32.mrf.mxu0 }
 0x1b6   :  { %v409_v46 = vadd.f32 %v2973_v42, %v408_v39 }
 0x1b7   :  { %v3346_v40 = vpop.f32.mrf.mxu0 }
 0x1b8   :  { %v4095_v49 = vmax.f32 %v409_v46, 0.0 }
 0x1b9   :  { %v413_v43 = vpop.f32.mrf.mxu0 }
 0x1ba   :  { %v414_v44 = vadd.f32 %v2973_v42, %v413_v43 }
 0x1bb   :  { %v3349_v45 = vpop.f32.mrf.mxu0 }
 0x1bc   :  { %v4090_v47 = vmax.f32 %v414_v44, 0.0 }
 0x1be   :  { %3351 = vmatpush3.xpose.msk.msra.mxu1 %vm422_vm13, %v4090_v47 }
 0x1bf   :  { %3352 = vmatprep.subr.mxu1 %v3860_v2 }
 0x1c2   :  { %3353 = vmatpush3.xpose.msk.msra.mxu1 %vm422_vm13, %v4095_v49 }
 0x1c3   :  { %3354 = vmatprep.subr.mxu1 %v3860_v2 }
 0x1c6   :  { %3355 = vmatpush3.xpose.msk.msra.mxu1 %vm422_vm13, %v4100_v51 }
 0x1c7   :  { %3356 = vmatprep.subr.mxu1 %v3860_v2 }
 0x1ca   :  { %3357 = vmatpush3.xpose.msk.msra.mxu1 %vm422_vm13, %v4105_v53 }
 0x1cb   :  { %3358 = vmatprep.subr.mxu1 %v3860_v2 }
 0x1ce   :  { %3359 = vmatpush3.xpose.msk.msra.mxu1 %vm422_vm13, %v4110_v54 }
 0x1cf   :  { %3400 = vmatprep.subr.mxu1 %v3860_v2 }
 0x1d1   :  { %3361 = vmatmul.mubr.msk.f32.vlgmr.msra.gmra.mxu1 %vm422_vm13, %v4110_v54 }
 0x1d2   :  { %3363 = vmatprep.mubr.msk.f32.mxu1 %vm3861_vm0, %v3860_v2 }
 0x1d5   :  { %3364 = vmatmul.mubr.msk.f32.gmra.mxu1 %vm422_vm13, %v4105_v53 }
 0x1d6   :  { %3366 = vmatprep.mubr.msk.f32.mxu1 %vm3861_vm0, %v3860_v2 }
 0x1d9   :  { %3367 = vmatmul.mubr.msk.f32.gmra.mxu1 %vm422_vm13, %v4100_v51 }
 0x1da   :  { %3369 = vmatprep.mubr.msk.f32.mxu1 %vm3861_vm0, %v3860_v2 }
 0x1dd   :  { %3370 = vmatmul.mubr.msk.f32.gmra.mxu1 %vm422_vm13, %v4095_v49 }
 0x1de   :  { %3372 = vmatprep.mubr.msk.f32.mxu1 %vm3861_vm0, %v3860_v2 }
 0x1e1   :  { %3373 = vmatmul.mubr.msk.f32.gmra.mxu1 %vm422_vm13, %v4090_v47 }
 0x1e2   :  { %3410 = vmatprep.mubr.msk.f32.mxu1 %vm3861_vm0, %v3860_v2 }
 0x291   :  { %v4135_v55 = vpop.f32.mrf.mxu1 }
 0x292   :  { %v528_v43 = vmul.f32 0.01, %v4135_v55 }
 0x293   :  { %v3362_v56 = vpop.f32.mrf.mxu1 }
 0x295   :  { %v509_v57 = vpop.f32.mrf.mxu1 }
 0x296   :  { %v529_v37 = vmul.f32 0.01, %v509_v57 }
 0x297   :  { %v3365_v58 = vpop.f32.mrf.mxu1 }
 0x299   :  { %v514_v59 = vpop.f32.mrf.mxu1 }
 0x29a   :  { %v530_v28 = vmul.f32 0.01, %v514_v59 }
 0x29b   :  { %v3368_v60 = vpop.f32.mrf.mxu1 }
 0x29d   :  { %v519_v61 = vpop.f32.mrf.mxu1 }
 0x29e   :  { %v531_v22 = vmul.f32 0.01, %v519_v61 }
 0x29f   :  { %v3371_v62 = vpop.f32.mrf.mxu1 }
 0x2a1   :  { %v524_v63 = vpop.f32.mrf.mxu1 }
 0x2a2   :  { %3376 = vmatpush3.msra.mxu0 %v524_v63  ;;  %v532_v4 = vmul.f32 0.01, %v524_v63 }
 0x2a3   :  { %v3374_v0 = vpop.f32.mrf.mxu1  ;;  %3377 = vmatprep.subr.mxu0 %v3860_v2 }
 0x2a4   :  { %3378 = vmatpush3.msra.mxu0 %v519_v61 }
 0x2a5   :  { %3379 = vmatprep.subr.mxu0 %v3860_v2 }
 0x2a6   :  { %3380 = vmatpush3.msra.mxu0 %v514_v59 }
 0x2a7   :  { %3381 = vmatprep.subr.mxu0 %v3860_v2 }
 0x2a8   :  { %3382 = vmatpush3.msra.mxu0 %v509_v57 }
 0x2a9   :  { %3383 = vmatprep.subr.mxu0 %v3860_v2 }
 0x2aa   :  { %3384 = vmatpush3.msra.mxu0 %v4135_v55 }
 0x2ab   :  { %3386 = vmatmul.mubr.msk.f32.vlgmr.msra.gmra.mxu0 %vm70_vm6, %v4135_v55  ;;  %3425 = vmatprep.subr.mxu0 %v3860_v2 }
 0x2ac   :  { %3388 = vmatprep.mubr.msk.f32.mxu0 %vm3861_vm0, %v3860_v2 }
 0x2af   :  { %3389 = vmatmul.mubr.msk.f32.gmra.mxu0 %vm70_vm6, %v509_v57 }
 0x2b0   :  { %3391 = vmatprep.mubr.msk.f32.mxu0 %vm3861_vm0, %v3860_v2 }
 0x2b3   :  { %3392 = vmatmul.mubr.msk.f32.gmra.mxu0 %vm70_vm6, %v514_v59 }
 0x2b4   :  { %3394 = vmatprep.mubr.msk.f32.mxu0 %vm3861_vm0, %v3860_v2 }
 0x2b7   :  { %3395 = vmatmul.mubr.msk.f32.gmra.mxu0 %vm70_vm6, %v519_v61 }
 0x2b8   :  { %3397 = vmatprep.mubr.msk.f32.mxu0 %vm3861_vm0, %v3860_v2 }
 0x2bb   :  { %3398 = vmatmul.mubr.msk.f32.gmra.mxu0 %vm70_vm6, %v524_v63 }
 0x2bc   :  { %3435 = vmatprep.mubr.msk.f32.mxu0 %vm3861_vm0, %v3860_v2 }
 0x36b   :  { %v614_v1 = vpop.f32.mrf.mxu0 }
 0x36c   :  { %v638_v38 = vmul.f32 0.0001, %v614_v1 }
 0x36d   :  { %v3387_v3 = vpop.f32.mrf.mxu0 }
 0x36e   :  { %v643_v44 = vadd.f32 %v638_v38, %v528_v43 }
 0x36f   :  { %v619_v5 = vpop.f32.mrf.mxu0 }
 0x370   :  { %v639_v27 = vmul.f32 0.0001, %v619_v5  ;;  %v663_v48 = vsel %vm70_vm6, %v643_v44, -inf  ;;  %v648_v50 = vsel %vm70_vm6, %v643_v44, inf }
 0x371   :  { %v3390_v7 = vpop.f32.mrf.mxu0 }
 0x372   :  { %v4169_v39 = vadd.f32 %v639_v27, %v529_v37 }
 0x373   :  { %v624_v8 = vpop.f32.mrf.mxu0 }
 0x374   :  { %v640_v26 = vmul.f32 0.0001, %v624_v8  ;;  %v666_v45 = vsel %vm70_vm6, %v4169_v39, -inf  ;;  %v651_v46 = vsel %vm70_vm6, %v4169_v39, inf }
 0x375   :  { %v3393_v9 = vpop.f32.mrf.mxu0 }
 0x376   :  { %v4163_v35 = vadd.f32 %v640_v26, %v530_v28 }
 0x377   :  { %v629_v10 = vpop.f32.mrf.mxu0 }
 0x378   :  { %v641_v13 = vmul.f32 0.0001, %v629_v10  ;;  %v669_v40 = vsel %vm70_vm6, %v4163_v35, -inf  ;;  %v654_v42 = vsel %vm70_vm6, %v4163_v35, inf }
 0x379   :  { %v3396_v11 = vpop.f32.mrf.mxu0 }
 0x37a   :  { %v4159_v29 = vadd.f32 %v641_v13, %v531_v22 }
 0x37b   :  { %v634_v12 = vpop.f32.mrf.mxu0 }
 0x37c   :  { %v642_v20 = vmul.f32 0.0001, %v634_v12  ;;  %v672_v36 = vsel %vm70_vm6, %v4159_v29, -inf  ;;  %v657_v25 = vsel %vm70_vm6, %v4159_v29, inf }
 0x37d   :  { %v3399_v21 = vpop.f32.mrf.mxu0 }
 0x37e   :  { %v647_v24 = vadd.f32 %v642_v20, %v532_v4 }
 0x380   :  { %v675_v31 = vsel %vm70_vm6, %v647_v24, -inf  ;;  %v660_v32 = vsel %vm70_vm6, %v647_v24, inf }
 0x381   :  { %676 = vmax.xlane.f32.xlu0 %v675_v31  ;;  %661 = vmin.xlane.f32.xlu1 %v660_v32 }
 0x385   :  { %673 = vmax.xlane.f32.xlu0 %v672_v36  ;;  %658 = vmin.xlane.f32.xlu1 %v657_v25 }
 0x389   :  { %670 = vmax.xlane.f32.xlu0 %v669_v40  ;;  %655 = vmin.xlane.f32.xlu1 %v654_v42 }
 0x38d   :  { %667 = vmax.xlane.f32.xlu0 %v666_v45  ;;  %652 = vmin.xlane.f32.xlu1 %v651_v46 }
 0x391   :  { %664 = vmax.xlane.f32.xlu0 %v663_v48  ;;  %649 = vmin.xlane.f32.xlu1 %v648_v50  ;;  %v1006_v50 = vld [vmem:[%s4987_s1 + $0x48] sm:$0xff] }
 0x40a   :  { %v677_v52 = vpop.xlane.xlu0 %676  ;;  %v662_v56 = vpop.xlane.xlu1 %661 }
 0x40b   :  { %v682_v57 = vsub.f32 %v677_v52, %v662_v56  ;;  %v687_v11 = vsub.f32 %v647_v24, %v662_v56  ;;  %v1005_v52 = vld [vmem:[%s4987_s1 + $0x40] sm:$0xff]  ;;  %v1004_v56 = vld [vmem:[%s4987_s1 + $0x38] sm:$0xff] }
 0x40d   :  { %vm692_vm14 = vcmp.eq.f32.partialorder %v682_v57, 0.0 }
 0x40e   :  { %v697_v55 = vsel %vm692_vm14, 1.0, %v682_v57  ;;  %v674_v58 = vpop.xlane.xlu0 %673  ;;  %v659_v59 = vpop.xlane.xlu1 %658  ;;  %v1003_v57 = vld [vmem:[%s4987_s1 + $0x30] sm:$0xff] }
 0x40f   :  { %3756 = vrcp.f32 %v697_v55  ;;  %v681_v60 = vsub.f32 %v674_v58, %v659_v59  ;;  %v686_v21 = vsub.f32 %v4159_v29, %v659_v59 }
 0x411   :  { %vm691_vm15 = vcmp.eq.f32.partialorder %v681_v60, 0.0 }
 0x412   :  { %v696_v61 = vsel %vm691_vm15, 1.0, %v681_v60  ;;  %v671_v62 = vpop.xlane.xlu0 %670  ;;  %v656_v63 = vpop.xlane.xlu1 %655 }
 0x413   :  { %3758 = vrcp.f32 %v696_v61  ;;  %v680_v0 = vsub.f32 %v671_v62, %v656_v63  ;;  %v685_v31 = vsub.f32 %v4163_v35, %v656_v63 }
 0x415   :  { %vm690_vm7 = vcmp.eq.f32.partialorder %v680_v0, 0.0 }
 0x416   :  { %v695_v1 = vsel %vm690_vm7, 1.0, %v680_v0  ;;  %v668_v3 = vpop.xlane.xlu0 %667  ;;  %v653_v5 = vpop.xlane.xlu1 %652  ;;  %vm1965_vm7 = vcmask 64512  }
 0x417   :  { %3760 = vrcp.f32 %v695_v1  ;;  %v679_v7 = vsub.f32 %v668_v3, %v653_v5  ;;  %v684_v28 = vsub.f32 %v4169_v39, %v653_v5 }
 0x419   :  { %vm689_vm8 = vcmp.eq.f32.partialorder %v679_v7, 0.0 }
 0x41a   :  { %v694_v8 = vsel %vm689_vm8, 1.0, %v679_v7  ;;  %v665_v9 = vpop.xlane.xlu0 %664  ;;  %v650_v10 = vpop.xlane.xlu1 %649 }
 0x41b   :  { %3762 = vrcp.f32 %v694_v8  ;;  %v678_v12 = vsub.f32 %v665_v9, %v650_v10  ;;  %v683_v36 = vsub.f32 %v643_v44, %v650_v10 }
 0x41c   :  { %v3757_v4 = vpop.eup %3756 }
 0x41d   :  { %v707_v13 = vmul.f32 %v3757_v4, %v687_v11  ;;  %vm688_vm9 = vcmp.eq.f32.partialorder %v678_v12, 0.0  ;;  %v3015_v11 = vld [vmem:[%s4987_s1 + $0x50] ss:$0 sm:$0xff] }
 0x41e   :  { %v693_v20 = vsel %vm688_vm9, 1.0, %v678_v12 }
 0x41f   :  { %3764 = vrcp.f32 %v693_v20  ;;  %3401 = vmatpush3.xpose.msk.msra.mxu1 %vm70_vm6, %v707_v13 }
 0x420   :  { %v3759_v22 = vpop.eup %3758  ;;  %3402 = vmatprep.subr.mxu1 %v3860_v2 }
 0x421   :  { %v705_v26 = vmul.f32 %v3759_v22, %v686_v21 }
 0x423   :  { %3403 = vmatpush3.xpose.msk.msra.mxu1 %vm70_vm6, %v705_v26 }
 0x424   :  { %v3761_v24 = vpop.eup %3760  ;;  %3404 = vmatprep.subr.mxu1 %v3860_v2 }
 0x425   :  { %v703_v32 = vmul.f32 %v3761_v24, %v685_v31 }
 0x427   :  { %3405 = vmatpush3.xpose.msk.msra.mxu1 %vm70_vm6, %v703_v32 }
 0x428   :  { %v3763_v29 = vpop.eup %3762  ;;  %3406 = vmatprep.subr.mxu1 %v3860_v2 }
 0x429   :  { %v701_v27 = vmul.f32 %v3763_v29, %v684_v28 }
 0x42b   :  { %3407 = vmatpush3.xpose.msk.msra.mxu1 %vm70_vm6, %v701_v27 }
 0x42c   :  { %v3765_v25 = vpop.eup %3764  ;;  %3408 = vmatprep.subr.mxu1 %v3860_v2 }
 0x42d   :  { %v699_v35 = vmul.f32 %v3765_v25, %v683_v36 }
 0x42f   :  { %3409 = vmatpush3.xpose.msk.msra.mxu1 %vm70_vm6, %v699_v35 }
 0x430   :  { %3461 = vmatprep.subr.mxu1 %v3860_v2 }
 0x432   :  { %3411 = vmatmul.mubr.msk.f32.vlgmr.msra.gmra.mxu1 %vm70_vm6, %v699_v35 }
 0x433   :  { %3413 = vmatprep.mubr.msk.f32.mxu1 %vm3861_vm0, %v3860_v2 }
 0x436   :  { %3414 = vmatmul.mubr.msk.f32.gmra.mxu1 %vm70_vm6, %v701_v27 }
 0x437   :  { %3416 = vmatprep.mubr.msk.f32.mxu1 %vm3861_vm0, %v3860_v2 }
 0x43a   :  { %3417 = vmatmul.mubr.msk.f32.gmra.mxu1 %vm70_vm6, %v703_v32 }
 0x43b   :  { %3419 = vmatprep.mubr.msk.f32.mxu1 %vm3861_vm0, %v3860_v2 }
 0x43e   :  { %3420 = vmatmul.mubr.msk.f32.gmra.mxu1 %vm70_vm6, %v705_v26 }
 0x43f   :  { %3422 = vmatprep.mubr.msk.f32.mxu1 %vm3861_vm0, %v3860_v2 }
 0x442   :  { %3423 = vmatmul.mubr.msk.f32.gmra.mxu1 %vm70_vm6, %v707_v13 }
 0x443   :  { %3471 = vmatprep.mubr.msk.f32.mxu1 %vm3861_vm0, %v3860_v2 }
 0x4f2   :  { %v4210_v37 = vpop.f32.mrf.mxu1 }
 0x4f4   :  { %v3412_v38 = vpop.f32.mrf.mxu1 }
 0x4f6   :  { %v4212_v39 = vpop.f32.mrf.mxu1 }
 0x4f8   :  { %v3415_v40 = vpop.f32.mrf.mxu1 }
 0x4fa   :  { %v4214_v42 = vpop.f32.mrf.mxu1 }
 0x4fc   :  { %v3418_v43 = vpop.f32.mrf.mxu1 }
 0x4fe   :  { %v4216_v44 = vpop.f32.mrf.mxu1 }
 0x500   :  { %v3421_v45 = vpop.f32.mrf.mxu1 }
 0x502   :  { %v4218_v46 = vpop.f32.mrf.mxu1 }
 0x503   :  { %3426 = vmatpush3.msk.msra.mxu0 %vm3921_vm2, %v4218_v46 }
 0x504   :  { %v3424_v48 = vpop.f32.mrf.mxu1  ;;  %3427 = vmatprep.subr.mxu0 %v3860_v2 }
 0x505   :  { %3428 = vmatpush3.msk.msra.mxu0 %vm3925_vm3, %v4216_v44 }
 0x506   :  { %3429 = vmatprep.subr.mxu0 %v3860_v2 }
 0x507   :  { %3430 = vmatpush3.msk.msra.mxu0 %vm3929_vm4, %v4214_v42 }
 0x508   :  { %3431 = vmatprep.subr.mxu0 %v3860_v2 }
 0x509   :  { %3432 = vmatpush3.msk.msra.mxu0 %vm3936_vm5, %v4212_v39 }
 0x50a   :  { %3433 = vmatprep.subr.mxu0 %v3860_v2 }
 0x50b   :  { %3434 = vmatpush3.msk.msra.mxu0 %vm3917_vm1, %v4210_v37 }
 0x50c   :  { %3436 = vmatmul.mubr.msk.f32.vlgmr.msra.gmra.mxu0 %vm70_vm6, %v3862_v41  ;;  %3438 = vmatprep.subr.mxu0 %v3860_v2 }
 0x50d   :  { %3439 = vmatpush3.msra.mxu0 %v1006_v50  ;;  %3446 = vmatprep.mubr.msk.f32.mxu0 %vm3861_vm0, %v3860_v2 }
 0x50e   :  { %3440 = vmatprep.subr.mxu0 %v3860_v2 }
 0x50f   :  { %3441 = vmatpush3.msra.mxu0 %v1005_v52 }
 0x510   :  { %3442 = vmatprep.subr.mxu0 %v3860_v2 }
 0x511   :  { %3443 = vmatpush3.msra.mxu0 %v1004_v56 }
 0x512   :  { %3444 = vmatprep.subr.mxu0 %v3860_v2 }
 0x513   :  { %3445 = vmatpush3.msra.mxu0 %v1003_v57 }
 0x514   :  { %3447 = vmatmul.mubr.msk.f32.vlgmr.msra.gmra.mxu0 %vm422_vm13, %v4110_v54  ;;  %3486 = vmatprep.subr.mxu0 %v3860_v2 }
 0x515   :  { %3449 = vmatprep.mubr.msk.f32.mxu0 %vm3861_vm0, %v3860_v2 }
 0x518   :  { %3450 = vmatmul.mubr.msk.f32.gmra.mxu0 %vm422_vm13, %v4105_v53 }
 0x519   :  { %3452 = vmatprep.mubr.msk.f32.mxu0 %vm3861_vm0, %v3860_v2 }
 0x51c   :  { %3453 = vmatmul.mubr.msk.f32.gmra.mxu0 %vm422_vm13, %v4100_v51 }
 0x51d   :  { %3455 = vmatprep.mubr.msk.f32.mxu0 %vm3861_vm0, %v3860_v2 }
 0x520   :  { %3456 = vmatmul.mubr.msk.f32.gmra.mxu0 %vm422_vm13, %v4095_v49 }
 0x521   :  { %3458 = vmatprep.mubr.msk.f32.mxu0 %vm3861_vm0, %v3860_v2 }
 0x524   :  { %3459 = vmatmul.mubr.msk.f32.gmra.mxu0 %vm422_vm13, %v4090_v47 }
 0x525   :  { %3496 = vmatprep.mubr.msk.f32.mxu0 %vm3861_vm0, %v3860_v2 }
 0x5cc   :  { %v4280_v53 = vpop.f32.mrf.mxu0 }
 0x5ce   :  { %v3437_v54 = vpop.f32.mrf.mxu0 }
 0x5d4   :  { %v1073_v55 = vpop.f32.mrf.mxu0 }
 0x5d6   :  { %v3448_v51 = vpop.f32.mrf.mxu0 }
 0x5d8   :  { %v1078_v58 = vpop.f32.mrf.mxu0 }
 0x5da   :  { %v3451_v59 = vpop.f32.mrf.mxu0 }
 0x5dc   :  { %v1083_v60 = vpop.f32.mrf.mxu0 }
 0x5de   :  { %v3454_v61 = vpop.f32.mrf.mxu0 }
 0x5e0   :  { %v1088_v62 = vpop.f32.mrf.mxu0 }
 0x5e2   :  { %v3457_v49 = vpop.f32.mrf.mxu0 }
 0x5e4   :  { %v1093_v63 = vpop.f32.mrf.mxu0 }
 0x5e5   :  { %3462 = vmatpush3.msra.mxu1 %v1093_v63 }
 0x5e6   :  { %v3460_v0 = vpop.f32.mrf.mxu0  ;;  %3463 = vmatprep.subr.mxu1 %v3860_v2 }
 0x5e7   :  { %3464 = vmatpush3.msra.mxu1 %v1088_v62 }
 0x5e8   :  { %3465 = vmatprep.subr.mxu1 %v3860_v2 }
 0x5e9   :  { %3466 = vmatpush3.msra.mxu1 %v1083_v60 }
 0x5ea   :  { %3467 = vmatprep.subr.mxu1 %v3860_v2 }
 0x5eb   :  { %3468 = vmatpush3.msra.mxu1 %v1078_v58 }
 0x5ec   :  { %3469 = vmatprep.subr.mxu1 %v3860_v2 }
 0x5ed   :  { %3470 = vmatpush3.msra.mxu1 %v1073_v55 }
 0x5ee   :  { %3472 = vmatmul.mubr.msk.f32.vlgmr.msra.gmra.mxu1 %vm70_vm6, %v4050_v18  ;;  %3511 = vmatprep.subr.mxu1 %v3860_v2 }
 0x5ef   :  { %3474 = vmatprep.mubr.msk.f32.mxu1 %vm3861_vm0, %v3860_v2 }
 0x5f2   :  { %3475 = vmatmul.mubr.msk.f32.gmra.mxu1 %vm70_vm6, %v4058_v23 }
 0x5f3   :  { %3477 = vmatprep.mubr.msk.f32.mxu1 %vm3861_vm0, %v3860_v2 }
 0x5f6   :  { %3478 = vmatmul.mubr.msk.f32.gmra.mxu1 %vm70_vm6, %v4066_v30 }
 0x5f7   :  { %3480 = vmatprep.mubr.msk.f32.mxu1 %vm3861_vm0, %v3860_v2 }
 0x5fa   :  { %3481 = vmatmul.mubr.msk.f32.gmra.mxu1 %vm70_vm6, %v4075_v33 }
 0x5fb   :  { %3483 = vmatprep.mubr.msk.f32.mxu1 %vm3861_vm0, %v3860_v2 }
 0x5fe   :  { %3484 = vmatmul.mubr.msk.f32.gmra.mxu1 %vm70_vm6, %v4081_v34 }
 0x5ff   :  { %3521 = vmatprep.mubr.msk.f32.mxu1 %vm3861_vm0, %v3860_v2 }
 0x6ae   :  { %v1168_v47 = vpop.f32.mrf.mxu1 }
 0x6af   :  { %v1169_v32 = vadd.f32 %v3015_v11, %v1168_v47 }
 0x6b0   :  { %v3473_v1 = vpop.f32.mrf.mxu1 }
 0x6b1   :  { %v4330_v29 = vmax.f32 %v1169_v32, 0.0 }
 0x6b2   :  { %v1173_v3 = vpop.f32.mrf.mxu1 }
 0x6b3   :  { %v1174_v31 = vadd.f32 %v3015_v11, %v1173_v3 }
 0x6b4   :  { %v3476_v5 = vpop.f32.mrf.mxu1 }
 0x6b5   :  { %v4325_v28 = vmax.f32 %v1174_v31, 0.0 }
 0x6b6   :  { %v1178_v7 = vpop.f32.mrf.mxu1 }
 0x6b7   :  { %v1179_v22 = vadd.f32 %v3015_v11, %v1178_v7 }
 0x6b8   :  { %v3479_v8 = vpop.f32.mrf.mxu1 }
 0x6b9   :  { %v4320_v24 = vmax.f32 %v1179_v22, 0.0 }
 0x6ba   :  { %v1183_v9 = vpop.f32.mrf.mxu1 }
 0x6bb   :  { %v1184_v20 = vadd.f32 %v3015_v11, %v1183_v9 }
 0x6bc   :  { %v3482_v10 = vpop.f32.mrf.mxu1 }
 0x6bd   :  { %v4315_v26 = vmax.f32 %v1184_v20, 0.0 }
 0x6be   :  { %v1188_v12 = vpop.f32.mrf.mxu1 }
 0x6bf   :  { %v1189_v4 = vadd.f32 %v3015_v11, %v1188_v12 }
 0x6c0   :  { %v3485_v13 = vpop.f32.mrf.mxu1 }
 0x6c1   :  { %v4310_v21 = vmax.f32 %v1189_v4, 0.0 }
 0x6c3   :  { %3487 = vmatpush3.xpose.msk.msra.mxu0 %vm1197_vm10, %v4310_v21 }
 0x6c4   :  { %3488 = vmatprep.subr.mxu0 %v3860_v2 }
 0x6c7   :  { %3489 = vmatpush3.xpose.msk.msra.mxu0 %vm1197_vm10, %v4315_v26 }
 0x6c8   :  { %3490 = vmatprep.subr.mxu0 %v3860_v2 }
 0x6cb   :  { %3491 = vmatpush3.xpose.msk.msra.mxu0 %vm1197_vm10, %v4320_v24 }
 0x6cc   :  { %3492 = vmatprep.subr.mxu0 %v3860_v2 }
 0x6cf   :  { %3493 = vmatpush3.xpose.msk.msra.mxu0 %vm1197_vm10, %v4325_v28 }
 0x6d0   :  { %3494 = vmatprep.subr.mxu0 %v3860_v2 }
 0x6d3   :  { %3495 = vmatpush3.xpose.msk.msra.mxu0 %vm1197_vm10, %v4330_v29 }
 0x6d4   :  { %3536 = vmatprep.subr.mxu0 %v3860_v2 }
 0x6d6   :  { %3497 = vmatmul.mubr.msk.f32.vlgmr.msra.gmra.mxu0 %vm1197_vm10, %v4330_v29 }
 0x6d7   :  { %3499 = vmatprep.mubr.msk.f32.mxu0 %vm3861_vm0, %v3860_v2 }
 0x6da   :  { %3500 = vmatmul.mubr.msk.f32.gmra.mxu0 %vm1197_vm10, %v4325_v28 }
 0x6db   :  { %3502 = vmatprep.mubr.msk.f32.mxu0 %vm3861_vm0, %v3860_v2 }
 0x6de   :  { %3503 = vmatmul.mubr.msk.f32.gmra.mxu0 %vm1197_vm10, %v4320_v24 }
 0x6df   :  { %3505 = vmatprep.mubr.msk.f32.mxu0 %vm3861_vm0, %v3860_v2 }
 0x6e2   :  { %3506 = vmatmul.mubr.msk.f32.gmra.mxu0 %vm1197_vm10, %v4315_v26 }
 0x6e3   :  { %3508 = vmatprep.mubr.msk.f32.mxu0 %vm3861_vm0, %v3860_v2 }
 0x6e6   :  { %3509 = vmatmul.mubr.msk.f32.gmra.mxu0 %vm1197_vm10, %v4310_v21 }
 0x6e7   :  { %3546 = vmatprep.mubr.msk.f32.mxu0 %vm3861_vm0, %v3860_v2 }
 0x796   :  { %v4355_v27 = vpop.f32.mrf.mxu0 }
 0x797   :  { %v1303_v32 = vmul.f32 0.01, %v4355_v27 }
 0x798   :  { %v3498_v36 = vpop.f32.mrf.mxu0 }
 0x79a   :  { %v1284_v25 = vpop.f32.mrf.mxu0 }
 0x79b   :  { %v1304_v4 = vmul.f32 0.01, %v1284_v25 }
 0x79c   :  { %v3501_v35 = vpop.f32.mrf.mxu0 }
 0x79e   :  { %v1289_v38 = vpop.f32.mrf.mxu0 }
 0x79f   :  { %v1305_v8 = vmul.f32 0.01, %v1289_v38 }
 0x7a0   :  { %v3504_v40 = vpop.f32.mrf.mxu0 }
 0x7a2   :  { %v1294_v43 = vpop.f32.mrf.mxu0 }
 0x7a3   :  { %v1306_v0 = vmul.f32 0.01, %v1294_v43 }
 0x7a4   :  { %v3507_v45 = vpop.f32.mrf.mxu0 }
 0x7a6   :  { %v1299_v48 = vpop.f32.mrf.mxu0 }
 0x7a7   :  { %3512 = vmatpush3.msra.mxu1 %v1299_v48  ;;  %v1307_v61 = vmul.f32 0.01, %v1299_v48 }
 0x7a8   :  { %v3510_v50 = vpop.f32.mrf.mxu0  ;;  %3513 = vmatprep.subr.mxu1 %v3860_v2 }
 0x7a9   :  { %3514 = vmatpush3.msra.mxu1 %v1294_v43 }
 0x7aa   :  { %3515 = vmatprep.subr.mxu1 %v3860_v2 }
 0x7ab   :  { %3516 = vmatpush3.msra.mxu1 %v1289_v38 }
 0x7ac   :  { %3517 = vmatprep.subr.mxu1 %v3860_v2 }
 0x7ad   :  { %3518 = vmatpush3.msra.mxu1 %v1284_v25 }
 0x7ae   :  { %3519 = vmatprep.subr.mxu1 %v3860_v2 }
 0x7af   :  { %3520 = vmatpush3.msra.mxu1 %v4355_v27 }
 0x7b0   :  { %3522 = vmatmul.mubr.msk.f32.vlgmr.msra.gmra.mxu1 %vm70_vm6, %v4355_v27  ;;  %3561 = vmatprep.subr.mxu1 %v3860_v2 }
 0x7b1   :  { %3524 = vmatprep.mubr.msk.f32.mxu1 %vm3861_vm0, %v3860_v2 }
 0x7b4   :  { %3525 = vmatmul.mubr.msk.f32.gmra.mxu1 %vm70_vm6, %v1284_v25 }
 0x7b5   :  { %3527 = vmatprep.mubr.msk.f32.mxu1 %vm3861_vm0, %v3860_v2 }
 0x7b8   :  { %3528 = vmatmul.mubr.msk.f32.gmra.mxu1 %vm70_vm6, %v1289_v38 }
 0x7b9   :  { %3530 = vmatprep.mubr.msk.f32.mxu1 %vm3861_vm0, %v3860_v2 }
 0x7bc   :  { %3531 = vmatmul.mubr.msk.f32.gmra.mxu1 %vm70_vm6, %v1294_v43 }
 0x7bd   :  { %3533 = vmatprep.mubr.msk.f32.mxu1 %vm3861_vm0, %v3860_v2 }
 0x7c0   :  { %3534 = vmatmul.mubr.msk.f32.gmra.mxu1 %vm70_vm6, %v1299_v48 }
 0x7c1   :  { %3571 = vmatprep.mubr.msk.f32.mxu1 %vm3861_vm0, %v3860_v2 }
 0x870   :  { %v1389_v52 = vpop.f32.mrf.mxu1 }
 0x871   :  { %v1413_v13 = vmul.f32 0.0001, %v1389_v52 }
 0x872   :  { %v3523_v56 = vpop.f32.mrf.mxu1 }
 0x873   :  { %v1418_v36 = vadd.f32 %v1413_v13, %v1303_v32 }
 0x874   :  { %v1394_v57 = vpop.f32.mrf.mxu1 }
 0x875   :  { %v1414_v9 = vmul.f32 0.0001, %v1394_v57  ;;  %v1438_v38 = vsel %vm70_vm6, %v1418_v36, -inf  ;;  %v1423_v40 = vsel %vm70_vm6, %v1418_v36, inf }
 0x876   :  { %v3526_v54 = vpop.f32.mrf.mxu1 }
 0x877   :  { %v4389_v20 = vadd.f32 %v1414_v9, %v1304_v4 }
 0x878   :  { %v1399_v55 = vpop.f32.mrf.mxu1 }
 0x879   :  { %v1415_v1 = vmul.f32 0.0001, %v1399_v55  ;;  %v1441_v35 = vsel %vm70_vm6, %v4389_v20, -inf  ;;  %v1426_v25 = vsel %vm70_vm6, %v4389_v20, inf }
 0x87a   :  { %v3529_v51 = vpop.f32.mrf.mxu1 }
 0x87b   :  { %v4383_v10 = vadd.f32 %v1415_v1, %v1305_v8 }
 0x87c   :  { %v1404_v58 = vpop.f32.mrf.mxu1 }
 0x87d   :  { %v1416_v62 = vmul.f32 0.0001, %v1404_v58  ;;  %v1444_v22 = vsel %vm70_vm6, %v4383_v10, -inf  ;;  %v1429_v31 = vsel %vm70_vm6, %v4383_v10, inf }
 0x87e   :  { %v3532_v59 = vpop.f32.mrf.mxu1 }
 0x87f   :  { %v4379_v3 = vadd.f32 %v1416_v62, %v1306_v0 }
 0x880   :  { %v1409_v60 = vpop.f32.mrf.mxu1 }
 0x881   :  { %v1417_v49 = vmul.f32 0.0001, %v1409_v60  ;;  %v1447_v11 = vsel %vm70_vm6, %v4379_v3, -inf  ;;  %v1432_v12 = vsel %vm70_vm6, %v4379_v3, inf }
 0x882   :  { %v3535_v63 = vpop.f32.mrf.mxu1 }
 0x883   :  { %v1422_v47 = vadd.f32 %v1417_v49, %v1307_v61 }
 0x885   :  { %v1450_v5 = vsel %vm70_vm6, %v1422_v47, -inf  ;;  %v1435_v7 = vsel %vm70_vm6, %v1422_v47, inf }
 0x886   :  { %1451 = vmax.xlane.f32.xlu0 %v1450_v5  ;;  %1436 = vmin.xlane.f32.xlu1 %v1435_v7 }
 0x88a   :  { %1448 = vmax.xlane.f32.xlu0 %v1447_v11  ;;  %1433 = vmin.xlane.f32.xlu1 %v1432_v12 }
 0x88e   :  { %1445 = vmax.xlane.f32.xlu0 %v1444_v22  ;;  %1430 = vmin.xlane.f32.xlu1 %v1429_v31 }
 0x892   :  { %1442 = vmax.xlane.f32.xlu0 %v1441_v35  ;;  %1427 = vmin.xlane.f32.xlu1 %v1426_v25 }
 0x896   :  { %1439 = vmax.xlane.f32.xlu0 %v1438_v38  ;;  %1424 = vmin.xlane.f32.xlu1 %v1423_v40 }
 0x90f   :  { %v1452_v43 = vpop.xlane.xlu0 %1451  ;;  %v1437_v45 = vpop.xlane.xlu1 %1436 }
 0x910   :  { %v1457_v48 = vsub.f32 %v1452_v43, %v1437_v45  ;;  %v1462_v0 = vsub.f32 %v1422_v47, %v1437_v45 }
 0x912   :  { %vm1467_vm11 = vcmp.eq.f32.partialorder %v1457_v48, 0.0 }
 0x913   :  { %v1472_v27 = vsel %vm1467_vm11, 1.0, %v1457_v48  ;;  %v1449_v50 = vpop.xlane.xlu0 %1448  ;;  %v1434_v52 = vpop.xlane.xlu1 %1433 }
 0x914   :  { %3766 = vrcp.f32 %v1472_v27  ;;  %v1456_v56 = vsub.f32 %v1449_v50, %v1434_v52  ;;  %v1461_v9 = vsub.f32 %v4379_v3, %v1434_v52  ;;  %v1774_v52 = vld [vmem:[%s4987_s1 + $0x60] sm:$0xff] }
 0x916   :  { %vm1466_vm12 = vcmp.eq.f32.partialorder %v1456_v56, 0.0 }
 0x917   :  { %v1471_v57 = vsel %vm1466_vm12, 1.0, %v1456_v56  ;;  %v1446_v54 = vpop.xlane.xlu0 %1445  ;;  %v1431_v55 = vpop.xlane.xlu1 %1430  ;;  %v1773_v56 = vld [vmem:[%s4987_s1 + $0x58] sm:$0xff] }
 0x918   :  { %3768 = vrcp.f32 %v1471_v57  ;;  %v1455_v51 = vsub.f32 %v1446_v54, %v1431_v55  ;;  %v1460_v4 = vsub.f32 %v4383_v10, %v1431_v55 }
 0x91a   :  { %vm1465_vm13 = vcmp.eq.f32.partialorder %v1455_v51, 0.0 }
 0x91b   :  { %v1470_v58 = vsel %vm1465_vm13, 1.0, %v1455_v51  ;;  %v1443_v59 = vpop.xlane.xlu0 %1442  ;;  %v1428_v60 = vpop.xlane.xlu1 %1427 }
 0x91c   :  { %3770 = vrcp.f32 %v1470_v58  ;;  %v1454_v61 = vsub.f32 %v1443_v59, %v1428_v60  ;;  %v1459_v22 = vsub.f32 %v4389_v20, %v1428_v60 }
 0x91e   :  { %vm1464_vm14 = vcmp.eq.f32.partialorder %v1454_v61, 0.0 }
 0x91f   :  { %v1469_v62 = vsel %vm1464_vm14, 1.0, %v1454_v61  ;;  %v1440_v49 = vpop.xlane.xlu0 %1439  ;;  %v1425_v63 = vpop.xlane.xlu1 %1424 }
 0x920   :  { %3772 = vrcp.f32 %v1469_v62  ;;  %v1453_v1 = vsub.f32 %v1440_v49, %v1425_v63  ;;  %v1458_v32 = vsub.f32 %v1418_v36, %v1425_v63 }
 0x921   :  { %v3767_v5 = vpop.eup %3766 }
 0x922   :  { %v1482_v7 = vmul.f32 %v3767_v5, %v1462_v0  ;;  %vm1463_vm15 = vcmp.eq.f32.partialorder %v1453_v1, 0.0 }
 0x923   :  { %v1468_v8 = vsel %vm1463_vm15, 1.0, %v1453_v1 }
 0x924   :  { %3774 = vrcp.f32 %v1468_v8  ;;  %3537 = vmatpush3.xpose.msk.msra.mxu0 %vm70_vm6, %v1482_v7 }
 0x925   :  { %v3769_v11 = vpop.eup %3768  ;;  %3538 = vmatprep.subr.mxu0 %v3860_v2 }
 0x926   :  { %v1480_v12 = vmul.f32 %v3769_v11, %v1461_v9 }
 0x928   :  { %3539 = vmatpush3.xpose.msk.msra.mxu0 %vm70_vm6, %v1480_v12 }
 0x929   :  { %v3771_v47 = vpop.eup %3770  ;;  %3540 = vmatprep.subr.mxu0 %v3860_v2 }
 0x92a   :  { %v1478_v13 = vmul.f32 %v3771_v47, %v1460_v4 }
 0x92c   :  { %3541 = vmatpush3.xpose.msk.msra.mxu0 %vm70_vm6, %v1478_v13 }
 0x92d   :  { %v3773_v3 = vpop.eup %3772  ;;  %3542 = vmatprep.subr.mxu0 %v3860_v2 }
 0x92e   :  { %v1476_v31 = vmul.f32 %v3773_v3, %v1459_v22 }
 0x930   :  { %3543 = vmatpush3.xpose.msk.msra.mxu0 %vm70_vm6, %v1476_v31 }
 0x931   :  { %v3775_v35 = vpop.eup %3774  ;;  %3544 = vmatprep.subr.mxu0 %v3860_v2 }
 0x932   :  { %v1474_v10 = vmul.f32 %v3775_v35, %v1458_v32 }
 0x934   :  { %3545 = vmatpush3.xpose.msk.msra.mxu0 %vm70_vm6, %v1474_v10 }
 0x935   :  { %3593 = vmatprep.subr.mxu0 %v3860_v2 }
 0x937   :  { %3547 = vmatmul.mubr.msk.f32.vlgmr.msra.gmra.mxu0 %vm70_vm6, %v1474_v10 }
 0x938   :  { %3549 = vmatprep.mubr.msk.f32.mxu0 %vm3861_vm0, %v3860_v2 }
 0x93b   :  { %3550 = vmatmul.mubr.msk.f32.gmra.mxu0 %vm70_vm6, %v1476_v31 }
 0x93c   :  { %3552 = vmatprep.mubr.msk.f32.mxu0 %vm3861_vm0, %v3860_v2 }
 0x93f   :  { %3553 = vmatmul.mubr.msk.f32.gmra.mxu0 %vm70_vm6, %v1478_v13 }
 0x940   :  { %3555 = vmatprep.mubr.msk.f32.mxu0 %vm3861_vm0, %v3860_v2 }
 0x943   :  { %3556 = vmatmul.mubr.msk.f32.gmra.mxu0 %vm70_vm6, %v1480_v12 }
 0x944   :  { %3558 = vmatprep.mubr.msk.f32.mxu0 %vm3861_vm0, %v3860_v2 }
 0x947   :  { %3559 = vmatmul.mubr.msk.f32.gmra.mxu0 %vm70_vm6, %v1482_v7 }
 0x948   :  { %3603 = vmatprep.mubr.msk.f32.mxu0 %vm3861_vm0, %v3860_v2 }
 0x9f7   :  { %v4430_v20 = vpop.f32.mrf.mxu0 }
 0x9f9   :  { %v3548_v36 = vpop.f32.mrf.mxu0 }
 0x9fb   :  { %v4432_v25 = vpop.f32.mrf.mxu0 }
 0x9fd   :  { %v3551_v38 = vpop.f32.mrf.mxu0 }
 0x9ff   :  { %v4434_v40 = vpop.f32.mrf.mxu0 }
 0xa01   :  { %v3554_v43 = vpop.f32.mrf.mxu0 }
 0xa03   :  { %v4436_v45 = vpop.f32.mrf.mxu0 }
 0xa05   :  { %v3557_v48 = vpop.f32.mrf.mxu0 }
 0xa07   :  { %v4438_v27 = vpop.f32.mrf.mxu0 }
 0xa08   :  { %3562 = vmatpush3.msk.msra.mxu1 %vm3921_vm2, %v4438_v27 }
 0xa09   :  { %v3560_v50 = vpop.f32.mrf.mxu0  ;;  %3563 = vmatprep.subr.mxu1 %v3860_v2 }
 0xa0a   :  { %3564 = vmatpush3.msk.msra.mxu1 %vm3925_vm3, %v4436_v45 }
 0xa0b   :  { %3565 = vmatprep.subr.mxu1 %v3860_v2 }
 0xa0c   :  { %3566 = vmatpush3.msk.msra.mxu1 %vm3929_vm4, %v4434_v40 }
 0xa0d   :  { %3567 = vmatprep.subr.mxu1 %v3860_v2 }
 0xa0e   :  { %3568 = vmatpush3.msk.msra.mxu1 %vm3936_vm5, %v4432_v25 }
 0xa0f   :  { %3569 = vmatprep.subr.mxu1 %v3860_v2 }
 0xa10   :  { %3570 = vmatpush3.msk.msra.mxu1 %vm3917_vm1, %v4430_v20 }
 0xa11   :  { %3572 = vmatmul.mubr.msk.f32.vlgmr.msra.gmra.mxu1 %vm70_vm6, %v3862_v41  ;;  %3574 = vmatprep.subr.mxu1 %v3860_v2 }
 0xa12   :  { %3575 = vmatpush3.msra.mxu1 %v1774_v52  ;;  %3578 = vmatprep.mubr.msk.f32.mxu1 %vm3861_vm0, %v3860_v2 }
 0xa13   :  { %3576 = vmatprep.subr.mxu1 %v3860_v2 }
 0xa14   :  { %3577 = vmatpush3.msra.mxu1 %v1773_v56 }
 0xa15   :  { %3579 = vmatmul.mubr.msk.f32.vlgmr.msra.gmra.mxu1 %vm1197_vm10, %v4330_v29  ;;  %3618 = vmatprep.subr.mxu1 %v3860_v2 }
 0xa16   :  { %3581 = vmatprep.mubr.msk.f32.mxu1 %vm3861_vm0, %v3860_v2 }
 0xa19   :  { %3582 = vmatmul.mubr.msk.f32.gmra.mxu1 %vm1197_vm10, %v4325_v28 }
 0xa1a   :  { %3584 = vmatprep.mubr.msk.f32.mxu1 %vm3861_vm0, %v3860_v2 }
 0xa1d   :  { %3585 = vmatmul.mubr.msk.f32.gmra.mxu1 %vm1197_vm10, %v4320_v24 }
 0xa1e   :  { %3587 = vmatprep.mubr.msk.f32.mxu1 %vm3861_vm0, %v3860_v2 }
 0xa21   :  { %3588 = vmatmul.mubr.msk.f32.gmra.mxu1 %vm1197_vm10, %v4315_v26 }
 0xa22   :  { %3590 = vmatprep.mubr.msk.f32.mxu1 %vm3861_vm0, %v3860_v2 }
 0xa25   :  { %3591 = vmatmul.mubr.msk.f32.gmra.mxu1 %vm1197_vm10, %v4310_v21 }
 0xa26   :  { %3628 = vmatprep.mubr.msk.f32.mxu1 %vm3861_vm0, %v3860_v2 }
 0xad1   :  { %v4492_v28 = vpop.f32.mrf.mxu1 }
 0xad3   :  { %v3573_v29 = vpop.f32.mrf.mxu1 }
 0xad5   :  { %v1841_v57 = vpop.f32.mrf.mxu1 }
 0xad7   :  { %v3580_v24 = vpop.f32.mrf.mxu1 }
 0xad9   :  { %v1846_v54 = vpop.f32.mrf.mxu1 }
 0xadb   :  { %v3583_v55 = vpop.f32.mrf.mxu1 }
 0xadd   :  { %v1851_v51 = vpop.f32.mrf.mxu1 }
 0xadf   :  { %v3586_v58 = vpop.f32.mrf.mxu1 }
 0xae1   :  { %v1856_v59 = vpop.f32.mrf.mxu1 }
 0xae3   :  { %v3589_v26 = vpop.f32.mrf.mxu1 }
 0xae5   :  { %v1861_v60 = vpop.f32.mrf.mxu1 }
 0xae6   :  { %3594 = vmatpush3.msra.mxu0 %v1861_v60 }
 0xae7   :  { %v3592_v61 = vpop.f32.mrf.mxu1  ;;  %3595 = vmatprep.subr.mxu0 %v3860_v2 }
 0xae8   :  { %3596 = vmatpush3.msra.mxu0 %v1856_v59 }
 0xae9   :  { %3597 = vmatprep.subr.mxu0 %v3860_v2 }
 0xaea   :  { %3598 = vmatpush3.msra.mxu0 %v1851_v51 }
 0xaeb   :  { %3599 = vmatprep.subr.mxu0 %v3860_v2 }
 0xaec   :  { %3600 = vmatpush3.msra.mxu0 %v1846_v54 }
 0xaed   :  { %3601 = vmatprep.subr.mxu0 %v3860_v2 }
 0xaee   :  { %3602 = vmatpush3.msra.mxu0 %v1841_v57 }
 0xaef   :  { %3604 = vmatmul.mubr.msk.f32.vlgmr.msra.gmra.mxu0 %vm70_vm6, %v4050_v18  ;;  %3643 = vmatprep.subr.mxu0 %v3860_v2 }
 0xaf0   :  { %3606 = vmatprep.mubr.msk.f32.mxu0 %vm3861_vm0, %v3860_v2 }
 0xaf3   :  { %3607 = vmatmul.mubr.msk.f32.gmra.mxu0 %vm70_vm6, %v4058_v23 }
 0xaf4   :  { %3609 = vmatprep.mubr.msk.f32.mxu0 %vm3861_vm0, %v3860_v2 }
 0xaf7   :  { %3610 = vmatmul.mubr.msk.f32.gmra.mxu0 %vm70_vm6, %v4066_v30 }
 0xaf8   :  { %3612 = vmatprep.mubr.msk.f32.mxu0 %vm3861_vm0, %v3860_v2 }
 0xafb   :  { %3613 = vmatmul.mubr.msk.f32.gmra.mxu0 %vm70_vm6, %v4075_v33  ;;  %v3057_v33 = vld [vmem:[%s4987_s1 + $0x68] ss:$0 sm:$0xff] }
 0xafc   :  { %3615 = vmatprep.mubr.msk.f32.mxu0 %vm3861_vm0, %v3860_v2 }
 0xaff   :  { %3616 = vmatmul.mubr.msk.f32.gmra.mxu0 %vm70_vm6, %v4081_v34 }
 0xb00   :  { %3653 = vmatprep.mubr.msk.f32.mxu0 %vm3861_vm0, %v3860_v2 }
 0xbaf   :  { %v1936_v18 = vpop.f32.mrf.mxu0 }
 0xbb0   :  { %v1937_v47 = vadd.f32 %v3057_v33, %v1936_v18 }
 0xbb1   :  { %v3605_v23 = vpop.f32.mrf.mxu0 }
 0xbb2   :  { %v1960_v22 = vmax.f32 %v1937_v47, 0.0 }
 0xbb3   :  { %v1941_v21 = vpop.f32.mrf.mxu0 }
 0xbb4   :  { %v1942_v12 = vadd.f32 %v3057_v33, %v1941_v21 }
 0xbb5   :  { %v3608_v62 = vpop.f32.mrf.mxu0 }
 0xbb6   :  { %v1961_v13 = vmax.f32 %v1942_v12, 0.0 }
 0xbb7   :  { %v1946_v30 = vpop.f32.mrf.mxu0 }
 0xbb8   :  { %v1947_v9 = vadd.f32 %v3057_v33, %v1946_v30 }
 0xbb9   :  { %v3611_v49 = vpop.f32.mrf.mxu0 }
 0xbba   :  { %v1962_v4 = vmax.f32 %v1947_v9, 0.0 }
 0xbbb   :  { %v1951_v63 = vpop.f32.mrf.mxu0 }
 0xbbc   :  { %v1952_v34 = vadd.f32 %v3057_v33, %v1951_v63 }
 0xbbd   :  { %v3614_v0 = vpop.f32.mrf.mxu0 }
 0xbbe   :  { %v1963_v11 = vmax.f32 %v1952_v34, 0.0 }
 0xbbf   :  { %v1956_v1 = vpop.f32.mrf.mxu0 }
 0xbc0   :  { %v1957_v5 = vadd.f32 %v3057_v33, %v1956_v1 }
 0xbc1   :  { %v3617_v7 = vpop.f32.mrf.mxu0 }
 0xbc2   :  { %v1964_v8 = vmax.f32 %v1957_v5, 0.0 }
 0xbc4   :  { %3619 = vmatpush3.xpose.msk.msra.mxu1 %vm1965_vm7, %v1964_v8 }
 0xbc5   :  { %3620 = vmatprep.subr.mxu1 %v3860_v2 }
 0xbc8   :  { %3621 = vmatpush3.xpose.msk.msra.mxu1 %vm1965_vm7, %v1963_v11 }
 0xbc9   :  { %3622 = vmatprep.subr.mxu1 %v3860_v2 }
 0xbcc   :  { %3623 = vmatpush3.xpose.msk.msra.mxu1 %vm1965_vm7, %v1962_v4 }
 0xbcd   :  { %3624 = vmatprep.subr.mxu1 %v3860_v2 }
 0xbd0   :  { %3625 = vmatpush3.xpose.msk.msra.mxu1 %vm1965_vm7, %v1961_v13 }
 0xbd1   :  { %3626 = vmatprep.subr.mxu1 %v3860_v2 }
 0xbd4   :  { %3627 = vmatpush3.xpose.msk.msra.mxu1 %vm1965_vm7, %v1960_v22 }
 0xbd5   :  { %3668 = vmatprep.subr.mxu1 %v3860_v2 }
 0xbd7   :  { %3629 = vmatmul.mubr.msk.f32.vlgmr.msra.gmra.mxu1 %vm1965_vm7, %v1960_v22 }
 0xbd8   :  { %3631 = vmatprep.mubr.msk.f32.mxu1 %vm3861_vm0, %v3860_v2 }
 0xbdb   :  { %3632 = vmatmul.mubr.msk.f32.gmra.mxu1 %vm1965_vm7, %v1961_v13 }
 0xbdc   :  { %3634 = vmatprep.mubr.msk.f32.mxu1 %vm3861_vm0, %v3860_v2 }
 0xbdf   :  { %3635 = vmatmul.mubr.msk.f32.gmra.mxu1 %vm1965_vm7, %v1962_v4 }
 0xbe0   :  { %3637 = vmatprep.mubr.msk.f32.mxu1 %vm3861_vm0, %v3860_v2 }
 0xbe3   :  { %3638 = vmatmul.mubr.msk.f32.gmra.mxu1 %vm1965_vm7, %v1963_v11 }
 0xbe4   :  { %3640 = vmatprep.mubr.msk.f32.mxu1 %vm3861_vm0, %v3860_v2 }
 0xbe7   :  { %3641 = vmatmul.mubr.msk.f32.gmra.mxu1 %vm1965_vm7, %v1964_v8 }
 0xbe8   :  { %3678 = vmatprep.mubr.msk.f32.mxu1 %vm3861_vm0, %v3860_v2 }
 0xc97   :  { %v4547_v3 = vpop.f32.mrf.mxu1 }
 0xc98   :  { %v2071_v12 = vmul.f32 0.01, %v4547_v3 }
 0xc99   :  { %v3630_v31 = vpop.f32.mrf.mxu1 }
 0xc9b   :  { %v2052_v32 = vpop.f32.mrf.mxu1 }
 0xc9c   :  { %v2072_v7 = vmul.f32 0.01, %v2052_v32 }
 0xc9d   :  { %v3633_v35 = vpop.f32.mrf.mxu1 }
 0xc9f   :  { %v2057_v10 = vpop.f32.mrf.mxu1 }
 0xca0   :  { %v2073_v63 = vmul.f32 0.01, %v2057_v10 }
 0xca1   :  { %v3636_v36 = vpop.f32.mrf.mxu1 }
 0xca2   :  { %v816_v36 = vsel %vm3925_vm3, %v4216_v44, 0.0 }
 0xca3   :  { %v2062_v38 = vpop.f32.mrf.mxu1 }
 0xca4   :  { %v2074_v18 = vmul.f32 0.01, %v2062_v38 }
 0xca5   :  { %v3639_v43 = vpop.f32.mrf.mxu1 }
 0xca6   :  { %v827_v43 = vsel %vm70_vm6, %v816_v36, 0.0  ;;  %v4651_v36 = vmul.f32 2.0, %v4210_v37 }
 0xca7   :  { %v2067_v48 = vpop.f32.mrf.mxu1 }
 0xca8   :  { %3644 = vmatpush3.msra.mxu0 %v2067_v48  ;;  %v2075_v59 = vmul.f32 0.01, %v2067_v48 }
 0xca9   :  { %v3642_v50 = vpop.f32.mrf.mxu1  ;;  %3645 = vmatprep.subr.mxu0 %v3860_v2 }
 0xcaa   :  { %3646 = vmatpush3.msra.mxu0 %v2062_v38  ;;  %v1589_v50 = vsel %vm3936_vm5, %v4432_v25, 0.0 }
 0xcab   :  { %3647 = vmatprep.subr.mxu0 %v3860_v2 }
 0xcac   :  { %3648 = vmatpush3.msra.mxu0 %v2057_v10 }
 0xcad   :  { %3649 = vmatprep.subr.mxu0 %v3860_v2 }
 0xcae   :  { %3650 = vmatpush3.msra.mxu0 %v2052_v32 }
 0xcaf   :  { %3651 = vmatprep.subr.mxu0 %v3860_v2 }
 0xcb0   :  { %3652 = vmatpush3.msra.mxu0 %v4547_v3 }
 0xcb1   :  { %3654 = vmatmul.mubr.msk.f32.vlgmr.msra.gmra.mxu0 %vm70_vm6, %v4547_v3  ;;  %3706 = vmatprep.subr.mxu0 %v3860_v2  ;;  %v814_v3 = vsel %vm3936_vm5, %v4212_v39, 0.0 }
 0xcb2   :  { %3656 = vmatprep.mubr.msk.f32.mxu0 %vm3861_vm0, %v3860_v2  ;;  %v821_v35 = vsel %vm70_vm6, %v814_v3, 0.0 }
 0xcb5   :  { %3657 = vmatmul.mubr.msk.f32.gmra.mxu0 %vm70_vm6, %v2052_v32  ;;  %v813_v32 = vsel %vm3917_vm1, %v4210_v37, 0.0 }
 0xcb6   :  { %3659 = vmatprep.mubr.msk.f32.mxu0 %vm3861_vm0, %v3860_v2 }
 0xcb9   :  { %3660 = vmatmul.mubr.msk.f32.gmra.mxu0 %vm70_vm6, %v2057_v10  ;;  %v818_v10 = vsel %vm70_vm6, %v813_v32, 0.0 }
 0xcba   :  { %3662 = vmatprep.mubr.msk.f32.mxu0 %vm3861_vm0, %v3860_v2 }
 0xcbd   :  { %3663 = vmatmul.mubr.msk.f32.gmra.mxu0 %vm70_vm6, %v2062_v38  ;;  %v815_v38 = vsel %vm3929_vm4, %v4214_v42, 0.0 }
 0xcbe   :  { %3665 = vmatprep.mubr.msk.f32.mxu0 %vm3861_vm0, %v3860_v2 }
 0xcc1   :  { %3666 = vmatmul.mubr.msk.f32.gmra.mxu0 %vm70_vm6, %v2067_v48  ;;  %v824_v48 = vsel %vm70_vm6, %v815_v38, 0.0  ;;  %v4654_v38 = vmul.f32 2.0, %v4212_v39 }
 0xcc2   :  { %3710 = vmatprep.mubr.msk.f32.mxu0 %vm3861_vm0, %v3860_v2 }
 0xd71   :  { %v2157_v52 = vpop.f32.mrf.mxu0 }
 0xd72   :  { %v2181_v34 = vmul.f32 0.0001, %v2157_v52  ;;  %v1588_v52 = vsel %vm3917_vm1, %v4430_v20, 0.0 }
 0xd73   :  { %v3655_v56 = vpop.f32.mrf.mxu0 }
 0xd74   :  { %v4592_v4 = vadd.f32 %v2181_v34, %v2071_v12  ;;  %v1596_v56 = vsel %vm70_vm6, %v1589_v50, 0.0 }
 0xd75   :  { %v2162_v29 = vpop.f32.mrf.mxu0 }
 0xd76   :  { %v2182_v0 = vmul.f32 0.0001, %v2162_v29  ;;  %v2206_v22 = vsel %vm70_vm6, %v4592_v4, -inf  ;;  %v2191_v31 = vsel %vm70_vm6, %v4592_v4, inf  ;;  %v1593_v29 = vsel %vm70_vm6, %v1588_v52, 0.0 }
 0xd77   :  { %v3658_v57 = vpop.f32.mrf.mxu0 }
 0xd78   :  { %v4585_v8 = vadd.f32 %v2182_v0, %v2072_v7  ;;  %v817_v57 = vsel %vm3921_vm2, %v4218_v46, 0.0 }
 0xd79   :  { %v2167_v24 = vpop.f32.mrf.mxu0 }
 0xd7a   :  { %v2183_v21 = vmul.f32 0.0001, %v2167_v24  ;;  %v2209_v47 = vsel %vm70_vm6, %v4585_v8, -inf  ;;  %v2194_v13 = vsel %vm70_vm6, %v4585_v8, inf  ;;  %v1590_v24 = vsel %vm3929_vm4, %v4434_v40, 0.0 }
 0xd7b   :  { %v3661_v54 = vpop.f32.mrf.mxu0 }
 0xd7c   :  { %v4579_v33 = vadd.f32 %v2183_v21, %v2073_v63  ;;  %v830_v54 = vsel %vm70_vm6, %v817_v57, 0.0 }
 0xd7d   :  { %v2172_v55 = vpop.f32.mrf.mxu0 }
 0xd7e   :  { %v2184_v26 = vmul.f32 0.0001, %v2172_v55  ;;  %v2212_v9 = vsel %vm70_vm6, %v4579_v33, -inf  ;;  %v2197_v11 = vsel %vm70_vm6, %v4579_v33, inf  ;;  %v1599_v55 = vsel %vm70_vm6, %v1590_v24, 0.0 }
 0xd7f   :  { %v3664_v51 = vpop.f32.mrf.mxu0 }
 0xd80   :  { %v4573_v62 = vadd.f32 %v2184_v26, %v2074_v18  ;;  %v1591_v51 = vsel %vm3925_vm3, %v4436_v45, 0.0 }
 0xd81   :  { %v2177_v58 = vpop.f32.mrf.mxu0 }
 0xd82   :  { %v2185_v60 = vmul.f32 0.0001, %v2177_v58  ;;  %v2215_v1 = vsel %vm70_vm6, %v4573_v62, -inf  ;;  %v2200_v5 = vsel %vm70_vm6, %v4573_v62, inf  ;;  %v1602_v58 = vsel %vm70_vm6, %v1591_v51, 0.0 }
 0xd83   :  { %v3667_v61 = vpop.f32.mrf.mxu0 }
 0xd84   :  { %v4571_v23 = vadd.f32 %v2185_v60, %v2075_v59  ;;  %v1592_v59 = vsel %vm3921_vm2, %v4438_v27, 0.0 }
 0xd85   :  { %v1605_v26 = vsel %vm70_vm6, %v1592_v59, 0.0 }
 0xd86   :  { %v2218_v30 = vsel %vm70_vm6, %v4571_v23, -inf  ;;  %v2203_v49 = vsel %vm70_vm6, %v4571_v23, inf }
 0xd87   :  { %2219 = vmax.xlane.f32.xlu0 %v2218_v30  ;;  %2204 = vmin.xlane.f32.xlu1 %v2203_v49 }
 0xd8b   :  { %2216 = vmax.xlane.f32.xlu0 %v2215_v1  ;;  %2201 = vmin.xlane.f32.xlu1 %v2200_v5 }
 0xd8f   :  { %2213 = vmax.xlane.f32.xlu0 %v2212_v9  ;;  %2198 = vmin.xlane.f32.xlu1 %v2197_v11 }
 0xd93   :  { %2210 = vmax.xlane.f32.xlu0 %v2209_v47  ;;  %2195 = vmin.xlane.f32.xlu1 %v2194_v13 }
 0xd97   :  { %2207 = vmax.xlane.f32.xlu0 %v2206_v22  ;;  %2192 = vmin.xlane.f32.xlu1 %v2191_v31 }
 0xd9b   :  { %822 = vadd.xlane.f32.xlu0 %v821_v35  ;;  %819 = vadd.xlane.f32.xlu1 %v818_v10  ;;  %v962_v35 = vrot.slane %v4280_v53, %v4040_v6 }
 0xd9f   :  { %828 = vadd.xlane.f32.xlu0 %v827_v43  ;;  %825 = vadd.xlane.f32.xlu1 %v824_v48 }
 0xda3   :  { %1597 = vadd.xlane.f32.xlu0 %v1596_v56  ;;  %1594 = vadd.xlane.f32.xlu1 %v1593_v29 }
 0xda7   :  { %831 = vadd.xlane.f32.xlu0 %v830_v54  ;;  %1600 = vadd.xlane.f32.xlu1 %v1599_v55 }
 0xdab   :  { %1603 = vadd.xlane.f32.xlu1 %v1602_v58 }
 0xdaf   :  { %1606 = vadd.xlane.f32.xlu1 %v1605_v26  ;;  %v4679_v26 = vmul.f32 2.0, %v4214_v42  ;;  %v4696_v42 = vmul.f32 2.0, %v4432_v25 }
 0xe10   :  { %v2220_v60 = vpop.xlane.xlu0 %2219  ;;  %v2205_v61 = vpop.xlane.xlu1 %2204 }
 0xe11   :  { %v2225_v18 = vsub.f32 %v2220_v60, %v2205_v61  ;;  %v2230_v31 = vsub.f32 %v4571_v23, %v2205_v61 }
 0xe13   :  { %vm2235_vm8 = vcmp.eq.f32.partialorder %v2225_v18, 0.0 }
 0xe14   :  { %v2240_v21 = vsel %vm2235_vm8, 1.0, %v2225_v18  ;;  %v2217_v30 = vpop.xlane.xlu0 %2216  ;;  %v2202_v49 = vpop.xlane.xlu1 %2201 }
 0xe15   :  { %3776 = vrcp.f32 %v2240_v21  ;;  %v2224_v63 = vsub.f32 %v2217_v30, %v2202_v49  ;;  %v2229_v23 = vsub.f32 %v4573_v62, %v2202_v49  ;;  %v4671_v62 = vmul.f32 2.0, %v4216_v44 }
 0xe16   :  { %v4686_v44 = vrot.slane %v4492_v28, %v4040_v6  ;;  %v4693_v21 = vmul.f32 2.0, %v4430_v20 }
 0xe17   :  { %vm2234_vm9 = vcmp.eq.f32.partialorder %v2224_v63, 0.0 }
 0xe18   :  { %v2239_v0 = vsel %vm2234_vm9, 1.0, %v2224_v63  ;;  %v2214_v1 = vpop.xlane.xlu0 %2213  ;;  %v2199_v5 = vpop.xlane.xlu1 %2198 }
 0xe19   :  { %3778 = vrcp.f32 %v2239_v0  ;;  %v2223_v7 = vsub.f32 %v2214_v1, %v2199_v5  ;;  %v2228_v54 = vsub.f32 %v4579_v33, %v2199_v5 }
 0xe1b   :  { %vm2233_vm11 = vcmp.eq.f32.partialorder %v2223_v7, 0.0 }
 0xe1c   :  { %v2238_v34 = vsel %vm2233_vm11, 1.0, %v2223_v7  ;;  %v2211_v9 = vpop.xlane.xlu0 %2210  ;;  %v2196_v11 = vpop.xlane.xlu1 %2195 }
 0xe1d   :  { %3780 = vrcp.f32 %v2238_v34  ;;  %v2222_v12 = vsub.f32 %v2211_v9, %v2196_v11  ;;  %v2227_v28 = vsub.f32 %v4585_v8, %v2196_v11  ;;  %v4715_v11 = vmul.f32 2.0, %v4218_v46 }
 0xe1f   :  { %vm2232_vm12 = vcmp.eq.f32.partialorder %v2222_v12, 0.0 }
 0xe20   :  { %v2237_v47 = vsel %vm2232_vm12, 1.0, %v2222_v12  ;;  %v2208_v13 = vpop.xlane.xlu0 %2207  ;;  %v4642_v22 = vpop.xlane.xlu1 %2192 }
 0xe21   :  { %3782 = vrcp.f32 %v2237_v47  ;;  %v2221_v3 = vsub.f32 %v2208_v13, %v4642_v22  ;;  %v2226_v12 = vsub.f32 %v4592_v4, %v4642_v22 }
 0xe22   :  { %v3777_v32 = vpop.eup %3776 }
 0xe23   :  { %v4648_v10 = vmul.f32 %v3777_v32, %v2230_v31  ;;  %vm2231_vm13 = vcmp.eq.f32.partialorder %v2221_v3, 0.0 }
 0xe24   :  { %v2236_v43 = vsel %vm2231_vm13, 1.0, %v2221_v3  ;;  %v823_v48 = vpop.xlane.xlu0 %822  ;;  %v820_v50 = vpop.xlane.xlu1 %819 }
 0xe25   :  { %3784 = vrcp.f32 %v2236_v43  ;;  %v4657_v52 = vadd.f32 %v962_v35, %v823_v48  ;;  %v4659_v56 = vadd.f32 %v962_v35, %v820_v50  ;;  %3669 = vmatpush3.xpose.msk.msra.mxu1 %vm70_vm6, %v4648_v10  ;;  %v908_v55 = vadd.f32 %v823_v48, %v820_v50 }
 0xe26   :  { %v3779_v53 = vpop.eup %3778  ;;  %3670 = vmatprep.subr.mxu1 %v3860_v2  ;;  %v4723_v50 = vmul.f32 2.0, %v4434_v40 }
 0xe27   :  { %v4664_v37 = vmul.f32 %v3779_v53, %v2229_v23  ;;  %v974_v39 = vsub.f32 %v4657_v52, %v4654_v38  ;;  %v973_v29 = vsub.f32 %v4659_v56, %v4651_v36 }
 0xe28   :  { %v829_v57 = vpop.xlane.xlu0 %828  ;;  %v826_v24 = vpop.xlane.xlu1 %825 }
 0xe29   :  { %v4674_v51 = vadd.f32 %v962_v35, %v829_v57  ;;  %v905_v58 = vmul.f32 0.0, %v826_v24  ;;  %3671 = vmatpush3.xpose.msk.msra.mxu1 %vm70_vm6, %v4664_v37  ;;  %v4681_v60 = vadd.f32 %v962_v35, %v826_v24  ;;  %v919_v18 = vadd.f32 %v908_v55, %v826_v24 }
 0xe2a   :  { %v3781_v59 = vpop.eup %3780  ;;  %3672 = vmatprep.subr.mxu1 %v3860_v2  ;;  %v906_v25 = vmul.f32 0.0, %v829_v57 }
 0xe2b   :  { %v4688_v33 = vmul.f32 %v3781_v59, %v2228_v54  ;;  %v976_v61 = vsub.f32 %v4674_v51, %v4671_v62  ;;  %v975_v30 = vsub.f32 %v4681_v60, %v4679_v26  ;;  %v909_v0 = vadd.f32 %v908_v55, %v905_v58 }
 0xe2c   :  { %v1598_v49 = vpop.xlane.xlu0 %1597  ;;  %v1595_v63 = vpop.xlane.xlu1 %1594  ;;  %v920_v9 = vadd.f32 %v919_v18, %v829_v57  ;;  %v4735_v18 = vmul.f32 2.0, %v4436_v45 }
 0xe2d   :  { %v4702_v1 = vadd.f32 %v4686_v44, %v1598_v49  ;;  %v4705_v5 = vadd.f32 %v4686_v44, %v1595_v63  ;;  %3673 = vmatpush3.xpose.msk.msra.mxu1 %vm70_vm6, %v4688_v33  ;;  %v910_v3 = vadd.f32 %v909_v0, %v906_v25  ;;  %v1683_v23 = vadd.f32 %v1598_v49, %v1595_v63 }
 0xe2e   :  { %v3783_v20 = vpop.eup %3782  ;;  %3674 = vmatprep.subr.mxu1 %v3860_v2 }
 0xe2f   :  { %v2244_v7 = vmul.f32 %v3783_v20, %v2227_v28  ;;  %v1744_v34 = vsub.f32 %v4702_v1, %v4696_v42  ;;  %v1743_v8 = vsub.f32 %v4705_v5, %v4693_v21  ;;  %v62_v21 = vld [vmem:[%s4986_s0 + $0x60] sm:$0xff]  ;;  %v60_v1 = vld [vmem:[%s4986_s0 + $0x50] sm:$0xff] }
 0xe30   :  { %v832_v47 = vpop.xlane.xlu0 %831  ;;  %v1601_v13 = vpop.xlane.xlu1 %1600 }
 0xe31   :  { %v907_v31 = vmul.f32 0.0, %v832_v47  ;;  %v921_v32 = vadd.f32 %v920_v9, %v832_v47  ;;  %v4719_v43 = vadd.f32 %v962_v35, %v832_v47  ;;  %3675 = vmatpush3.xpose.msk.msra.mxu1 %vm70_vm6, %v2244_v7  ;;  %v1680_v53 = vmul.f32 0.0, %v1601_v13 }
 0xe32   :  { %v3785_v48 = vpop.eup %3784  ;;  %v4726_v46 = vadd.f32 %v4686_v44, %v1601_v13  ;;  %3676 = vmatprep.subr.mxu1 %v3860_v2  ;;  %v1694_v58 = vadd.f32 %v1683_v23, %v1601_v13 }
 0xe33   :  { %v2242_v4 = vmul.f32 %v3785_v48, %v2226_v12  ;;  %v911_v22 = vadd.f32 %v910_v3, %v907_v31  ;;  %v922_v57 = vrot.slane %v921_v32, 4  ;;  %v977_v35 = vsub.f32 %v4719_v43, %v4715_v11 }
 0xe34   :  { %v1745_v24 = vsub.f32 %v4726_v46, %v4723_v50  ;;  %v1604_v54 = vpop.xlane.xlu1 %1603  ;;  %v1684_v49 = vadd.f32 %v1683_v23, %v1680_v53  ;;  %v4747_v3 = vmul.f32 2.0, %v4438_v27 }
 0xe35   :  { %v912_v55 = vrot.slane %v911_v22, 4  ;;  %v923_v40 = vadd.f32 %v922_v57, %v921_v32  ;;  %v1681_v59 = vmul.f32 0.0, %v1604_v54  ;;  %3677 = vmatpush3.xpose.msk.msra.mxu1 %vm70_vm6, %v2242_v4  ;;  %v4738_v63 = vadd.f32 %v4686_v44, %v1604_v54 }
 0xe36   :  { %3693 = vmatprep.subr.mxu1 %v3860_v2  ;;  %v1695_v20 = vadd.f32 %v1694_v58, %v1604_v54 }
 0xe37   :  { %v913_v28 = vadd.f32 %v912_v55, %v911_v22  ;;  %v924_v0 = vrot.slane %v923_v40, 2  ;;  %v1685_v25 = vadd.f32 %v1684_v49, %v1681_v59  ;;  %v1746_v9 = vsub.f32 %v4738_v63, %v4735_v18 }
 0xe38   :  { %3679 = vmatmul.mubr.msk.f32.vlgmr.msra.gmra.mxu1 %vm70_vm6, %v2242_v4  ;;  %v1607_v12 = vpop.xlane.xlu1 %1606 }
 0xe39   :  { %v914_v47 = vrot.slane %v913_v28, 2  ;;  %v925_v13 = vadd.f32 %v924_v0, %v923_v40  ;;  %v1682_v45 = vmul.f32 0.0, %v1607_v12  ;;  %v1696_v31 = vadd.f32 %v1695_v20, %v1607_v12  ;;  %3681 = vmatprep.mubr.msk.f32.mxu1 %vm3861_vm0, %v3860_v2 }
 0xe3a   :  { %v4750_v32 = vadd.f32 %v4686_v44, %v1607_v12 }
 0xe3b   :  { %v915_v48 = vadd.f32 %v914_v47, %v913_v28  ;;  %v926_v23 = vrot.slane %v925_v13, 1  ;;  %v1686_v53 = vadd.f32 %v1685_v25, %v1682_v45  ;;  %v1697_v22 = vrot.slane %v1696_v31, 4 }
 0xe3c   :  { %v1747_v4 = vsub.f32 %v4750_v32, %v4747_v3  ;;  %3682 = vmatmul.mubr.msk.f32.gmra.mxu1 %vm70_vm6, %v2244_v7  ;;  %v63_v3 = vld [vmem:[%s4986_s0 + $0x68] sm:$0xff] }
 0xe3d   :  { %v916_v57 = vrot.slane %v915_v48, 1  ;;  %v1687_v54 = vrot.slane %v1686_v53, 4  ;;  %v1698_v55 = vadd.f32 %v1697_v22, %v1696_v31  ;;  %3684 = vmatprep.mubr.msk.f32.mxu1 %vm3861_vm0, %v3860_v2  ;;  %v927_v40 = vadd.f32 %v926_v23, %v925_v13 }
 0xe3f   :  { %v917_v27 = vadd.f32 %v916_v57, %v915_v48  ;;  %v1688_v58 = vadd.f32 %v1687_v54, %v1686_v53  ;;  %v1699_v44 = vrot.slane %v1698_v55, 2 }
 0xe40   :  { %3685 = vmatmul.mubr.msk.f32.gmra.mxu1 %vm70_vm6, %v4688_v33 }
 0xe41   :  { %v928_v59 = vsub.f32 %v927_v40, %v917_v27  ;;  %vm929_vm14 = vcmp.gt.f32.partialorder %v917_v27, 0.0  ;;  %v1689_v49 = vrot.slane %v1688_v58, 2  ;;  %v1700_v28 = vadd.f32 %v1699_v44, %v1698_v55  ;;  %3687 = vmatprep.mubr.msk.f32.mxu1 %vm3861_vm0, %v3860_v2 }
 0xe42   :  { %v930_v7 = vsel %vm929_vm14, %v917_v27, 1.0 }
 0xe43   :  { %3786 = vrcp.f32 %v930_v7  ;;  %vm934_vm15 = vcmp.gt.f32.partialorder %v928_v59, 0.0  ;;  %v1690_v0 = vadd.f32 %v1689_v49, %v1688_v58  ;;  %v1701_v20 = vrot.slane %v1700_v28, 1 }
 0xe44   :  { %v935_v25 = vsel %vm934_vm15, %v928_v59, 1.0  ;;  %3688 = vmatmul.mubr.msk.f32.gmra.mxu1 %vm70_vm6, %v4664_v37 }
 0xe45   :  { %3788 = vrcp.f32 %v935_v25  ;;  %v1691_v33 = vrot.slane %v1690_v0, 1  ;;  %3690 = vmatprep.mubr.msk.f32.mxu1 %vm3861_vm0, %v3860_v2  ;;  %v1702_v47 = vadd.f32 %v1701_v20, %v1700_v28 }
 0xe47   :  { %v1692_v12 = vadd.f32 %v1691_v33, %v1690_v0 }
 0xe48   :  { %3691 = vmatmul.mubr.msk.f32.gmra.mxu1 %vm70_vm6, %v4648_v10 }
 0xe49   :  { %v1703_v13 = vsub.f32 %v1702_v47, %v1692_v12  ;;  %vm1704_vm7 = vcmp.gt.f32.partialorder %v1692_v12, 0.0  ;;  %3703 = vmatprep.mubr.msk.f32.mxu1 %vm3861_vm0, %v3860_v2 }
 0xe4a   :  { %v1705_v45 = vsel %vm1704_vm7, %v1692_v12, 1.0 }
 0xe4b   :  { %3790 = vrcp.f32 %v1705_v45  ;;  %vm1709_vm8 = vcmp.gt.f32.partialorder %v1703_v13, 0.0 }
 0xe4c   :  { %v1710_v37 = vsel %vm1709_vm8, %v1703_v13, 1.0  ;;  %v64_v13 = vld [vmem:[%s4986_s0 + $0x70] sm:$0xff] }
 0xe4d   :  { %3792 = vrcp.f32 %v1710_v37 }
 0xe50   :  { %v3787_v31 = vpop.eup %3786 }
 0xe51   :  { %v932_v48 = vmul.f32 16.0, %v3787_v31 }
 0xe52   :  { %v3789_v23 = vpop.eup %3788 }
 0xe53   :  { %v933_v53 = vsel %vm929_vm14, %v932_v48, 1.0  ;;  %v937_v22 = vmul.f32 24.0, %v3789_v23  ;;  %vm3863_vm14 = vmmov 1  }
 0xe54   :  { %v941_v57 = vmul.f32 0.0, %v933_v53 }
 0xe55   :  { %v938_v10 = vsel %vm934_vm15, %v937_v22, 1.0 }
 0xe56   :  { %v949_v54 = vmul.f32 0.0, %v938_v10  ;;  %v956_v55 = vadd.f32 %v941_v57, %v938_v10 }
 0xe58   :  { %v3791_v40 = vpop.eup %3790  ;;  %v954_v58 = vadd.f32 %v949_v54, %v933_v53  ;;  %v980_v44 = vmul.f32 -0.125, %v956_v55 }
 0xe59   :  { %v1707_v49 = vmul.f32 16.0, %v3791_v40 }
 0xe5a   :  { %v3793_v28 = vpop.eup %3792  ;;  %v978_v7 = vmul.f32 -0.125, %v954_v58  ;;  %v985_v0 = vmul.f32 %v980_v44, %v975_v30  ;;  %v986_v27 = vmul.f32 %v980_v44, %v976_v61  ;;  %v987_v26 = vmul.f32 %v980_v44, %v977_v35 }
 0xe5b   :  { %v1708_v20 = vsel %vm1704_vm7, %v1707_v49, 1.0  ;;  %v1712_v59 = vmul.f32 24.0, %v3793_v28 }
 0xe5c   :  { %v983_v25 = vmul.f32 %v978_v7, %v973_v29  ;;  %v984_v33 = vmul.f32 %v978_v7, %v974_v39  ;;  %v1716_v45 = vmul.f32 0.0, %v1708_v20  ;;  %v992_v62 = vmul.f32 1.442695, %v985_v0 }
 0xe5d   :  { %v1713_v47 = vsel %vm1709_vm8, %v1712_v59, 1.0  ;;  %v994_v60 = vmul.f32 1.442695, %v986_v27  ;;  %v996_v56 = vmul.f32 1.442695, %v987_v26 }
 0xe5e   :  { %v1719_v51 = vmul.f32 0.0, %v1713_v47  ;;  %v1726_v61 = vadd.f32 %v1716_v45, %v1713_v47  ;;  %v988_v30 = vmul.f32 1.442695, %v983_v25  ;;  %v990_v37 = vmul.f32 1.442695, %v984_v33 }
 0xe5f   :  { %3794 = vpow2.f32 %v992_v62 }
 0xe60   :  { %v1724_v12 = vadd.f32 %v1719_v51, %v1708_v20  ;;  %v1750_v36 = vmul.f32 -0.125, %v1726_v61  ;;  %3796 = vpow2.f32 %v994_v60 }
 0xe61   :  { %3798 = vpow2.f32 %v988_v30 }
 0xe62   :  { %v1748_v29 = vmul.f32 -0.125, %v1724_v12  ;;  %v1755_v38 = vmul.f32 %v1750_v36, %v1745_v24  ;;  %v1756_v52 = vmul.f32 %v1750_v36, %v1746_v9  ;;  %v1757_v39 = vmul.f32 %v1750_v36, %v1747_v4 }
 0xe63   :  { %3800 = vpow2.f32 %v990_v37 }
 0xe64   :  { %v1753_v11 = vmul.f32 %v1748_v29, %v1743_v8  ;;  %v1754_v43 = vmul.f32 %v1748_v29, %v1744_v34  ;;  %v1762_v50 = vmul.f32 1.442695, %v1755_v38  ;;  %3802 = vpow2.f32 %v996_v56  ;;  %v61_v34 = vld [vmem:[%s4986_s0 + $0x58] sm:$0xff]  ;;  %s3864_s0 = smov 112  }
 0xe65   :  { %v1764_v24 = vmul.f32 1.442695, %v1756_v52  ;;  %v1766_v18 = vmul.f32 1.442695, %v1757_v39 }
 0xe66   :  { %v1758_v46 = vmul.f32 1.442695, %v1753_v11  ;;  %v1760_v35 = vmul.f32 1.442695, %v1754_v43  ;;  %3804 = vpow2.f32 %v1762_v50 }
 0xe68   :  { %3806 = vpow2.f32 %v1758_v46 }
 0xe69   :  { %3808 = vpow2.f32 %v1760_v35 }
 0xe6a   :  { %3810 = vpow2.f32 %v1764_v24 }
 0xe6b   :  { %3812 = vpow2.f32 %v1766_v18 }
 0xe6c   :  { %v3795_v63 = vpop.eup %3794 }
 0xe6d   :  { %v3797_v9 = vpop.eup %3796  ;;  %v1000_v32 = vadd.f32 %v3795_v63, %v62_v21 }
 0xe6e   :  { %v3799_v42 = vpop.eup %3798  ;;  %v1001_v57 = vadd.f32 %v3797_v9, %v63_v3 }
 0xe6f   :  { %v998_v31 = vadd.f32 %v3799_v42, %v60_v1 }
 0xe70   :  { %v3801_v5 = vpop.eup %3800 }
 0xe71   :  { %v3803_v8 = vpop.eup %3802  ;;  %v999_v53 = vadd.f32 %v3801_v5, %v61_v34 }
 0xe72   :  { %v1002_v55 = vadd.f32 %v3803_v8, %v64_v13 }
 0xe73   :  { %v3805_v4 = vpop.eup %3804 }
 0xe74   :  { %v4822_v23 = vadd.f32 %v3805_v4, %v1000_v32 }
 0xe75   :  { %v3807_v48 = vpop.eup %3806 }
 0xe76   :  { %v3809_v22 = vpop.eup %3808  ;;  %v4824_v10 = vadd.f32 %v3807_v48, %v998_v31 }
 0xe77   :  { %v3811_v54 = vpop.eup %3810  ;;  %v4826_v40 = vadd.f32 %v3809_v22, %v999_v53 }
 0xe78   :  { %v3813_v58 = vpop.eup %3812  ;;  %v4828_v44 = vadd.f32 %v3811_v54, %v1001_v57 }
 0xe79   :  { %v4830_v49 = vadd.f32 %v3813_v58, %v1002_v55 }
 0xef8   :  { %v4832_v28 = vpop.f32.mrf.mxu1 }
 0xef9   :  { %v2356_v7 = vsel %vm3917_vm1, %v4832_v28, 0.0 }
 0xefa   :  { %v3680_v0 = vpop.f32.mrf.mxu1  ;;  %v2361_v27 = vsel %vm70_vm6, %v2356_v7, 0.0 }
 0xefb   :  { %2362 = vadd.xlane.f32.xlu0 %v2361_v27 }
 0xefc   :  { %v4838_v20 = vpop.f32.mrf.mxu1 }
 0xefd   :  { %v2357_v59 = vsel %vm3936_vm5, %v4838_v20, 0.0 }
 0xefe   :  { %v3683_v25 = vpop.f32.mrf.mxu1  ;;  %v2364_v33 = vsel %vm70_vm6, %v2357_v59, 0.0 }
 0xeff   :  { %2365 = vadd.xlane.f32.xlu1 %v2364_v33 }
 0xf00   :  { %v4844_v47 = vpop.f32.mrf.mxu1 }
 0xf01   :  { %v2358_v45 = vsel %vm3929_vm4, %v4844_v47, 0.0 }
 0xf02   :  { %v3686_v26 = vpop.f32.mrf.mxu1  ;;  %v2367_v62 = vsel %vm70_vm6, %v2358_v45, 0.0 }
 0xf03   :  { %2368 = vadd.xlane.f32.xlu0 %v2367_v62 }
 0xf04   :  { %v4850_v51 = vpop.f32.mrf.mxu1 }
 0xf05   :  { %v2359_v60 = vsel %vm3925_vm3, %v4850_v51, 0.0 }
 0xf06   :  { %v3689_v61 = vpop.f32.mrf.mxu1  ;;  %v2370_v30 = vsel %vm70_vm6, %v2359_v60, 0.0  ;;  %v2506_v60 = vmul.f32 2.0, %v4832_v28 }
 0xf07   :  { %2371 = vadd.xlane.f32.xlu0 %v2370_v30  ;;  %v2507_v61 = vmul.f32 2.0, %v4838_v20  ;;  %v2508_v30 = vmul.f32 2.0, %v4844_v47 }
 0xf08   :  { %v4856_v12 = vpop.f32.mrf.mxu1 }
 0xf09   :  { %3694 = vmatpush3.msk.msra.mxu1 %vm3921_vm2, %v4856_v12  ;;  %v2360_v37 = vsel %vm3921_vm2, %v4856_v12, 0.0 }
 0xf0a   :  { %v3692_v36 = vpop.f32.mrf.mxu1  ;;  %3695 = vmatprep.subr.mxu1 %v3860_v2  ;;  %v2373_v56 = vsel %vm70_vm6, %v2360_v37, 0.0  ;;  %v2509_v37 = vmul.f32 2.0, %v4850_v51 }
 0xf0b   :  { %3696 = vmatpush3.msk.msra.mxu1 %vm3925_vm3, %v4850_v51  ;;  %2374 = vadd.xlane.f32.xlu1 %v2373_v56  ;;  %vm2677_vm3 = vcmask 326784  }
 0xf0c   :  { %3697 = vmatprep.subr.mxu1 %v3860_v2 }
 0xf0d   :  { %3698 = vmatpush3.msk.msra.mxu1 %vm3929_vm4, %v4844_v47 }
 0xf0e   :  { %3699 = vmatprep.subr.mxu1 %v3860_v2 }
 0xf0f   :  { %3700 = vmatpush3.msk.msra.mxu1 %vm3936_vm5, %v4838_v20 }
 0xf10   :  { %3701 = vmatprep.subr.mxu1 %v3860_v2 }
 0xf11   :  { %3702 = vmatpush3.msk.msra.mxu1 %vm3917_vm1, %v4832_v28 }
 0xf12   :  { %3704 = vmatmul.mubr.msk.f32.vlgmr.msra.gmra.mxu1 %vm70_vm6, %v3862_v41  ;;  %3713 = vmatprep.subr.mxu1 %v3860_v2 }
 0xf13   :  { %3719 = vmatprep.mubr.msk.f32.mxu1 %vm3861_vm0, %v3860_v2 }
 0xf84   :  { %v2363_v15 = vpop.xlane.xlu0 %2362 }
 0xf88   :  { %v2366_v16 = vpop.xlane.xlu1 %2365 }
 0xf89   :  { %v2451_v38 = vadd.f32 %v2366_v16, %v2363_v15 }
 0xf8c   :  { %v2369_v29 = vpop.xlane.xlu0 %2368 }
 0xf8d   :  { %v2448_v52 = vmul.f32 0.0, %v2369_v29  ;;  %v2462_v11 = vadd.f32 %v2451_v38, %v2369_v29 }
 0xf8f   :  { %v2452_v50 = vadd.f32 %v2451_v38, %v2448_v52 }
 0xf90   :  { %v2372_v39 = vpop.xlane.xlu0 %2371 }
 0xf91   :  { %v2449_v43 = vmul.f32 0.0, %v2372_v39  ;;  %v2463_v46 = vadd.f32 %v2462_v11, %v2372_v39 }
 0xf93   :  { %v2453_v24 = vadd.f32 %v2452_v50, %v2449_v43  ;;  %v2510_v43 = vmul.f32 2.0, %v4856_v12 }
 0xf94   :  { %v2375_v35 = vpop.xlane.xlu1 %2374 }
 0xf95   :  { %v2450_v18 = vmul.f32 0.0, %v2375_v35  ;;  %v2464_v63 = vadd.f32 %v2463_v46, %v2375_v35 }
 0xf97   :  { %v2454_v9 = vadd.f32 %v2453_v24, %v2450_v18  ;;  %v2465_v21 = vrot.slane %v2464_v63, 4 }
 0xf99   :  { %v2455_v42 = vrot.slane %v2454_v9, 4  ;;  %v2466_v1 = vadd.f32 %v2465_v21, %v2464_v63 }
 0xf9b   :  { %v2456_v5 = vadd.f32 %v2455_v42, %v2454_v9  ;;  %v2467_v34 = vrot.slane %v2466_v1, 2 }
 0xf9d   :  { %v2457_v8 = vrot.slane %v2456_v5, 2  ;;  %v2468_v3 = vadd.f32 %v2467_v34, %v2466_v1 }
 0xf9f   :  { %v2458_v32 = vadd.f32 %v2457_v8, %v2456_v5  ;;  %v2469_v4 = vrot.slane %v2468_v3, 1 }
 0xfa1   :  { %v2459_v13 = vrot.slane %v2458_v32, 1  ;;  %v2470_v48 = vadd.f32 %v2469_v4, %v2468_v3 }
 0xfa3   :  { %v2460_v31 = vadd.f32 %v2459_v13, %v2458_v32 }
 0xfa5   :  { %v2471_v53 = vsub.f32 %v2470_v48, %v2460_v31  ;;  %vm2472_vm0 = vcmp.gt.f32.partialorder %v2460_v31, 0.0 }
 0xfa6   :  { %v2473_v22 = vsel %vm2472_vm0, %v2460_v31, 1.0 }
 0xfa7   :  { %3814 = vrcp.f32 %v2473_v22  ;;  %vm2477_vm2 = vcmp.gt.f32.partialorder %v2471_v53, 0.0 }
 0xfa8   :  { %v2478_v57 = vsel %vm2477_vm2, %v2471_v53, 1.0 }
 0xfa9   :  { %3816 = vrcp.f32 %v2478_v57 }
 0xfb4   :  { %v3815_v54 = vpop.eup %3814 }
 0xfb5   :  { %v2475_v58 = vmul.f32 16.0, %v3815_v54 }
 0xfb6   :  { %v3817_v55 = vpop.eup %3816 }
 0xfb7   :  { %v2480_v7 = vmul.f32 24.0, %v3817_v55  ;;  %v2476_v59 = vsel %vm2472_vm0, %v2475_v58, 1.0 }
 0xfb8   :  { %v2484_v33 = vmul.f32 0.0, %v2476_v59 }
 0xfb9   :  { %v2481_v0 = vsel %vm2477_vm2, %v2480_v7, 1.0 }
 0xfba   :  { %v2487_v27 = vmul.f32 0.0, %v2481_v0  ;;  %v2494_v45 = vadd.f32 %v2484_v33, %v2481_v0 }
 0xfbc   :  { %v2492_v25 = vadd.f32 %v2487_v27, %v2476_v59  ;;  %v2518_v46 = vmul.f32 -0.125, %v2494_v45 }
 0xfbe   :  { %v2516_v50 = vmul.f32 -0.125, %v2492_v25 }
 0xfd2   :  { %v2442_v26 = vpop.f32.mrf.mxu1 }
 0xfd3   :  { %v2500_v62 = vrot.slane %v2442_v26, %v4040_v6 }
 0xfd4   :  { %v3705_v36 = vpop.f32.mrf.mxu1 }
 0xfd5   :  { %v2501_v56 = vadd.f32 %v2500_v62, %v2363_v15  ;;  %v2502_v38 = vadd.f32 %v2500_v62, %v2366_v16  ;;  %v2503_v52 = vadd.f32 %v2500_v62, %v2369_v29  ;;  %v2504_v11 = vadd.f32 %v2500_v62, %v2372_v39 }
 0xfd6   :  { %v2505_v24 = vadd.f32 %v2500_v62, %v2375_v35 }
 0xfd7   :  { %v2511_v18 = vsub.f32 %v2501_v56, %v2506_v60  ;;  %v2512_v63 = vsub.f32 %v2502_v38, %v2507_v61  ;;  %v2513_v9 = vsub.f32 %v2503_v52, %v2508_v30  ;;  %v2514_v28 = vsub.f32 %v2504_v11, %v2509_v37 }
 0xfd8   :  { %v2515_v21 = vsub.f32 %v2505_v24, %v2510_v43 }
 0xfd9   :  { %v2521_v20 = vmul.f32 %v2516_v50, %v2511_v18  ;;  %v2522_v42 = vmul.f32 %v2516_v50, %v2512_v63  ;;  %v2523_v47 = vmul.f32 %v2518_v46, %v2513_v9  ;;  %v2524_v1 = vmul.f32 %v2518_v46, %v2514_v28 }
 0xfda   :  { %v2525_v51 = vmul.f32 %v2518_v46, %v2515_v21 }
 0xfdb   :  { %v2526_v5 = vmul.f32 1.442695, %v2521_v20  ;;  %v2528_v15 = vmul.f32 1.442695, %v2522_v42  ;;  %v2530_v16 = vmul.f32 1.442695, %v2523_v47 }
 0xfdc   :  { %v2532_v29 = vmul.f32 1.442695, %v2524_v1  ;;  %v2534_v39 = vmul.f32 1.442695, %v2525_v51 }
 0xfdd   :  { %3818 = vpow2.f32 %v2526_v5 }
 0xfde   :  { %3820 = vpow2.f32 %v2528_v15 }
 0xfdf   :  { %3822 = vpow2.f32 %v2530_v16 }
 0xfe0   :  { %3824 = vpow2.f32 %v2532_v29 }
 0xfe1   :  { %3826 = vpow2.f32 %v2534_v39 }
 0xfea   :  { %v3819_v12 = vpop.eup %3818 }
 0xfeb   :  { %v3821_v35 = vpop.eup %3820  ;;  %v2536_v34 = vadd.f32 %v3819_v12, %v4824_v10 }
 0xfec   :  { %v3823_v8 = vpop.eup %3822  ;;  %v2537_v3 = vadd.f32 %v3821_v35, %v4826_v40 }
 0xfed   :  { %v3825_v32 = vpop.eup %3824  ;;  %v2538_v4 = vadd.f32 %v3823_v8, %v4822_v23  ;;  %v2541_v43 = vmul.f32 0.25, %v2536_v34 }
 0xfee   :  { %v3827_v13 = vpop.eup %3826  ;;  %v2539_v31 = vadd.f32 %v3825_v32, %v4828_v44  ;;  %v2542_v52 = vmul.f32 0.25, %v2537_v3 }
 0xfef   :  { %v2665_v48 = vmul.f32 0.25, %v2538_v4  ;;  %v2540_v53 = vadd.f32 %v3827_v13, %v4830_v49  ;;  %v2543_v46 = vand.u32 2147483647, %v2541_v43 }
 0xff0   :  { %v2666_v22 = vmul.f32 0.25, %v2539_v31  ;;  %v2544_v11 = vand.u32 2147483647, %v2542_v52 }
 0xff1   :  { %v2668_v57 = vand.u32 2147483647, %v2665_v48  ;;  %v2667_v54 = vmul.f32 0.25, %v2540_v53 }
 0xff2   :  { %v2669_v55 = vand.u32 2147483647, %v2666_v22  ;;  %vm2546_vm2 = vcmp.gt.f32.partialorder %v2544_v11, 0.0 }
 0xff3   :  { %vm2671_vm9 = vcmp.gt.f32.partialorder %v2668_v57, 0.0  ;;  %v2670_v58 = vand.u32 2147483647, %v2667_v54  ;;  %vm2698_vm0 = vcmp.eq.f32.partialorder %v2668_v57, 0.0  ;;  %v2548_v50 = vsel %vm2546_vm2, %v2544_v11, inf }
 0xff4   :  { %vm2672_vm11 = vcmp.gt.f32.partialorder %v2669_v55, 0.0  ;;  %v2674_v10 = vsel %vm2671_vm9, %v2668_v57, inf  ;;  %vm2699_vm8 = vcmp.eq.f32.partialorder %v2669_v55, 0.0  ;;  %v2552_v24 = vsel %vm1197_vm10, %v2548_v50, inf }
 0xff5   :  { %v2675_v7 = vsel %vm2672_vm11, %v2669_v55, inf  ;;  %v2678_v40 = vsel %vm2677_vm3, %v2674_v10, inf  ;;  %vm2673_vm12 = vcmp.gt.f32.partialorder %v2670_v58, 0.0  ;;  %vm2700_vm7 = vcmp.eq.f32.partialorder %v2670_v58, 0.0 }
 0xff6   :  { %v2681_v0 = vsel %vm2677_vm3, %v2675_v7, inf  ;;  %2679 = vmin.xlane.f32.xlu0 %v2678_v40  ;;  %v2676_v23 = vsel %vm2673_vm12, %v2670_v58, inf  ;;  %vm2719_vm9 = vcmask 195584   ;;  %vm2566_vm12 = vcmp.eq.f32.partialorder %v2544_v11, 0.0 }
 0xff7   :  { %2682 = vmin.xlane.f32.xlu1 %v2681_v0  ;;  %v2684_v44 = vsel %vm2677_vm3, %v2676_v23, inf  ;;  %vm2545_vm3 = vcmp.gt.f32.partialorder %v2543_v46, 0.0 }
 0xff8   :  { %v2547_v18 = vsel %vm2545_vm3, %v2543_v46, inf }
 0xff9   :  { %v2549_v63 = vsel %vm1197_vm10, %v2547_v18, inf }
 0xffa   :  { %2685 = vmin.xlane.f32.xlu0 %v2684_v44 }
0x107f   :  { %v2680_v27 = vpop.xlane.xlu0 %2679 }
0x1080   :  { %v2683_v49 = vpop.xlane.xlu1 %2682 }
0x1081   :  { %v2687_v59 = vmin.f32 %v2680_v27, %v2683_v49 }
0x1083   :  { %v2686_v25 = vpop.xlane.xlu0 %2685 }
0x1084   :  { %v2688_v33 = vmin.f32 %v2687_v59, %v2686_v25 }
0x1086   :  { %v2689_v45 = vrot.slane %v2688_v33, 4 }
0x1088   :  { %v2690_v26 = vmin.f32 %v2688_v33, %v2689_v45 }
0x108a   :  { %v2691_v62 = vrot.slane %v2690_v26, 2 }
0x108c   :  { %v2692_v60 = vmin.f32 %v2690_v26, %v2691_v62 }
0x108e   :  { %v2693_v61 = vrot.slane %v2692_v60, 1 }
0x1090   :  { %v2694_v30 = vmin.f32 %v2692_v60, %v2693_v61 }
0x1092   :  { %vm2695_vm13 = vweird.f32 %v2694_v30 }
0x1093   :  { %vm2696_vm15 = vmxor %vm2695_vm13, %vm3863_vm14  ;;  %vm2565_vm13 = vcmp.eq.f32.partialorder %v2543_v46, 0.0 }
0x1094   :  { %v2697_v37 = vsel %vm2696_vm15, %v2694_v30, 1.0 }
0x1095   :  { %v4898_v36 = vsel %vm2700_vm7, %v2697_v37, %v2670_v58  ;;  %v4900_v56 = vsel %vm2699_vm8, %v2697_v37, %v2669_v55  ;;  %v4906_v38 = vsel %vm2698_vm0, %v2697_v37, %v2668_v57 }
0x1096   :  { %2711 = vrot.lane.b32.xlu1 %v4898_v36, %s3864_s0  ;;  %2709 = vrot.lane.b32.xlu0 %v4900_v56, %s3864_s0 }
0x109a   :  { %2707 = vrot.lane.b32.xlu1 %v4906_v38, %s3864_s0 }
0x10b5   :  { %2553 = vmin.xlane.f32.xlu0 %v2552_v24 }
0x10be   :  { %2550 = vmin.xlane.f32.xlu1 %v2549_v63 }
0x1108   :  { %v2712_v9 = vpop.permute.xlu1 %2711  ;;  %v2710_v28 = vpop.permute.xlu0 %2709 }
0x1109   :  { %3714 = vmatpush3.msk.msra.mxu1 %vm3929_vm4, %v2712_v9  ;;  %v2718_v21 = vsel %vm3929_vm4, %v2712_v9, 0.0  ;;  %v2717_v20 = vsel %vm3936_vm5, %v2710_v28, 0.0 }
0x110a   :  { %3715 = vmatprep.subr.mxu1 %v3860_v2  ;;  %v2726_v42 = vsel %vm2719_vm9, %v2718_v21, 0.0  ;;  %v2723_v47 = vsel %vm2719_vm9, %v2717_v20, 0.0  ;;  %v2848_v21 = vld [vmem:[%s4987_s1 + $0x78] sm:$0xff] }
0x110b   :  { %3716 = vmatpush3.msk.msra.mxu1 %vm3936_vm5, %v2710_v28  ;;  %2727 = vadd.xlane.f32.xlu0 %v2726_v42  ;;  %v2847_v42 = vld [vmem:[%s4987_s1 + $0x70] sm:$0xff] }
0x110c   :  { %2724 = vadd.xlane.f32.xlu1 %v2723_v47  ;;  %3717 = vmatprep.subr.mxu1 %v3860_v2  ;;  %v2708_v1 = vpop.permute.xlu1 %2707 }
0x110d   :  { %3718 = vmatpush3.msk.msra.mxu1 %vm3917_vm1, %v2708_v1  ;;  %v2716_v17 = vsel %vm3917_vm1, %v2708_v1, 0.0 }
0x110e   :  { %3720 = vmatmul.mubr.msk.f32.vlgmr.msra.gmra.mxu1 %vm2719_vm9, %v3862_v41  ;;  %v2720_v51 = vsel %vm2719_vm9, %v2716_v17, 0.0 }
0x110f   :  { %2721 = vadd.xlane.f32.xlu0 %v2720_v51 }
0x113e   :  { %v2554_v5 = vpop.xlane.xlu0 %2553 }
0x1147   :  { %v2551_v15 = vpop.xlane.xlu1 %2550 }
0x1148   :  { %v2555_v16 = vmin.f32 %v2551_v15, %v2554_v5 }
0x114a   :  { %v2556_v29 = vrot.slane %v2555_v16, 4 }
0x114c   :  { %v2557_v39 = vmin.f32 %v2555_v16, %v2556_v29 }
0x114e   :  { %v2558_v12 = vrot.slane %v2557_v39, 2 }
0x1150   :  { %v2559_v35 = vmin.f32 %v2557_v39, %v2558_v12 }
0x1152   :  { %v2560_v34 = vrot.slane %v2559_v35, 1 }
0x1154   :  { %v2561_v8 = vmin.f32 %v2559_v35, %v2560_v34 }
0x1156   :  { %vm2562_vm4 = vweird.f32 %v2561_v8 }
0x1157   :  { %vm2563_vm11 = vmxor %vm2562_vm4, %vm3863_vm14 }
0x1158   :  { %v2564_v3 = vsel %vm2563_vm11, %v2561_v8, 1.0 }
0x1159   :  { %v4932_v32 = vsel %vm2566_vm12, %v2564_v3, %v2544_v11  ;;  %v4938_v4 = vsel %vm2565_vm13, %v2564_v3, %v2543_v46 }
0x115a   :  { %3707 = vmatpush3.msk.msra.mxu0 %vm3936_vm5, %v4932_v32  ;;  %v2570_v49 = vsel %vm3936_vm5, %v4932_v32, 0.0  ;;  %v2569_v25 = vsel %vm3917_vm1, %v4938_v4, 0.0 }
0x115b   :  { %3708 = vmatprep.subr.mxu0 %v3860_v2  ;;  %v2574_v59 = vsel %vm1197_vm10, %v2570_v49, 0.0  ;;  %v2571_v33 = vsel %vm1197_vm10, %v2569_v25, 0.0 }
0x115c   :  { %3709 = vmatpush3.msk.msra.mxu0 %vm3917_vm1, %v4938_v4 }
0x115d   :  { %3711 = vmatmul.mubr.msk.f32.vlgmr.msra.gmra.mxu0 %vm1197_vm10, %v3862_v41 }
0x1194   :  { %v2728_v13 = vpop.xlane.xlu0 %2727 }
0x1195   :  { %v2725_v48 = vpop.xlane.xlu1 %2724 }
0x1198   :  { %v2722_v22 = vpop.xlane.xlu0 %2721 }
0x11ce   :  { %v2797_v31 = vpop.f32.mrf.mxu1 }
0x11cf   :  { %v2804_v53 = vrot.slane %v2797_v31, %v4040_v6 }
0x11d0   :  { %v3721_v57 = vpop.f32.mrf.mxu1 }
0x11d1   :  { %v2807_v54 = vmul.f32 %v2804_v53, %v2728_v13  ;;  %v2806_v55 = vmul.f32 %v2804_v53, %v2725_v48  ;;  %v2805_v58 = vmul.f32 %v2804_v53, %v2722_v22 }
0x11d3   :  { %vm2810_vm14 = vcmp.gt.f32.partialorder %v2807_v54, 0.0  ;;  %vm2809_vm15 = vcmp.gt.f32.partialorder %v2806_v55, 0.0  ;;  %vm2808_vm7 = vcmp.gt.f32.partialorder %v2805_v58, 0.0 }
0x11d4   :  { %v2813_v2 = vsel %vm2810_vm14, %v2807_v54, 1.0  ;;  %v2812_v10 = vsel %vm2809_vm15, %v2806_v55, 1.0  ;;  %v2811_v7 = vsel %vm2808_vm7, %v2805_v58, 1.0 }
0x11d5   :  { %3828 = vrsqrt.f32 %v2813_v2 }
0x11d6   :  { %3830 = vrsqrt.f32 %v2812_v10 }
0x11d7   :  { %3832 = vrsqrt.f32 %v2811_v7 }
0x11e2   :  { %v3829_v41 = vpop.eup %3828 }
0x11e3   :  { %v3831_v40 = vpop.eup %3830  ;;  %v2819_v0 = vsel %vm2810_vm14, %v3829_v41, 0.0 }
0x11e4   :  { %v3833_v23 = vpop.eup %3832  ;;  %2827 = vrot.lane.b32.xlu1 %v2819_v0, %s3865_s11  ;;  %v2818_v44 = vsel %vm2809_vm15, %v3831_v40, 0.0 }
0x11e5   :  { %2825 = vrot.lane.b32.xlu0 %v2818_v44, %s3865_s11  ;;  %v2817_v27 = vsel %vm2808_vm7, %v3833_v23, 0.0 }
0x11e8   :  { %2823 = vrot.lane.b32.xlu1 %v2817_v27, %s3865_s11 }
0x1204   :  { %2575 = vadd.xlane.f32.xlu0 %v2574_v59 }
0x120c   :  { %2572 = vadd.xlane.f32.xlu1 %v2571_v33 }
0x121d   :  { %v2645_v45 = vpop.f32.mrf.mxu0 }
0x121f   :  { %v3712_v26 = vpop.f32.mrf.mxu0 }
0x1256   :  { %v2828_v62 = vpop.permute.xlu1 %2827 }
0x1257   :  { %v2826_v60 = vpop.permute.xlu0 %2825  ;;  %v2834_v61 = vmul.f32 %v2828_v62, %v4898_v36  ;;  %v2835_v36 = vld [vmem:[%s4987_s1 + $0x80] sm:$0xff]  ;;  %s3866_s1 = smov [#allocation2]  }
0x1258   :  { %v2833_v30 = vmul.f32 %v2826_v60, %v4900_v56  ;;  %v2652_v56 = vrot.slane %v2645_v45, %v4040_v6  ;;  %s2951_s20 = sshll.u32 %s3866_s1, 4  ;;  %s2952_s20 = int_to_ptr.vmem [resolvable:$true] %s2951_s20 }
0x1259   :  { %2856 = vrot.lane.b32.xlu0 %v2834_v61, %s3864_s0  ;;  %s3838_s21 = scalar_lea.vmem %s2952_s20, 256  ;;  %p3843_p1 = scmp.lt.s32.totalorder %s2952_s20, %s2952_s20 }
0x125a   :  { %2854 = vrot.lane.b32.xlu1 %v2833_v30, %s3864_s0  ;;  %v2824_v19 = vpop.permute.xlu1 %2823  ;;  %p3839_p0 = scmp.ne.s32.totalorder %s2952_s20, %s3838_s21  ;;  %p3844_p2 = scmp.lt.s32.totalorder %s3838_s21, %s3838_s21 }
0x125b   :  { %v2832_v37 = vmul.f32 %v2824_v19, %v4906_v38 }
0x125c   :  { %p3845_p3 = por %p3844_p2, %p3843_p1 }
0x125d   :  { %2841 = vrot.lane.b32.xlu0 %v2836_v14, %s3865_s11 }
0x125e   :  { %2852 = vrot.lane.b32.xlu1 %v2832_v37, %s3864_s0  ;;  %p3846_p4 = pnand %p3845_p3, %p3839_p0 }
0x1262   :  { %2839 = vrot.lane.b32.xlu1 %v2835_v36, %s3865_s11 }
0x128d   :  { %v2576_v11 = vpop.xlane.xlu0 %2575 }
0x128e   :  { %v2654_v50 = vmul.f32 %v2652_v56, %v2576_v11 }
0x1290   :  { %vm2656_vm5 = vcmp.gt.f32.partialorder %v2654_v50, 0.0 }
0x1291   :  { %v2658_v24 = vsel %vm2656_vm5, %v2654_v50, 1.0 }
0x1295   :  { %v2573_v52 = vpop.xlane.xlu1 %2572 }
0x1296   :  { %v2653_v43 = vmul.f32 %v2652_v56, %v2573_v52 }
0x1298   :  { %vm2655_vm1 = vcmp.gt.f32.partialorder %v2653_v43, 0.0 }
0x1299   :  { %v2657_v46 = vsel %vm2655_vm1, %v2653_v43, 1.0 }
0x129a   :  { %3834 = vrsqrt.f32 %v2657_v46 }
0x129b   :  { %3836 = vrsqrt.f32 %v2658_v24 }
0x12a7   :  { %v3835_v63 = vpop.eup %3834 }
0x12a8   :  { %v3837_v9 = vpop.eup %3836  ;;  %v2661_v6 = vsel %vm2655_vm1, %v3835_v63, 0.0 }
0x12a9   :  { %v2662_v20 = vsel %vm2656_vm5, %v3837_v9, 0.0  ;;  %v2663_v47 = vmul.f32 %v2661_v6, %v4938_v4 }
0x12aa   :  { %v2664_v17 = vmul.f32 %v2662_v20, %v4932_v32 }
0x12cb   :  { %v2857_v38 = vpop.permute.xlu0 %2856 }
0x12cc   :  { %v2855_v18 = vpop.permute.xlu1 %2854  ;;  %3722 = vmatprep.subr.mxu0 %v2857_v38 }
0x12cd   :  { %3723 = vmatpush3.msra.mxu0 %v2857_v38 }
0x12ce   :  { %3724 = vmatprep.subr.mxu0 %v2855_v18 }
0x12cf   :  { %3725 = vmatpush3.msra.mxu0 %v2855_v18  ;;  %v2842_v1 = vpop.permute.xlu0 %2841 }
0x12d0   :  { %v2853_v28 = vpop.permute.xlu1 %2852  ;;  %v2846_v15 = vsel %vm1197_vm10, %v2664_v17, %v2842_v1 }
0x12d1   :  { %3726 = vmatprep.subr.mxu0 %v2853_v28 }
0x12d2   :  { %3727 = vmatpush3.msra.mxu0 %v2853_v28 }
0x12d3   :  { %3728 = vmatprep.subr.mxu0 %v2848_v21 }
0x12d4   :  { %3729 = vmatpush3.msra.mxu0 %v2848_v21  ;;  %v2840_v51 = vpop.permute.xlu1 %2839 }
0x12d5   :  { %v2845_v5 = vsel %vm1197_vm10, %v2663_v47, %v2840_v51  ;;  %3730 = vmatprep.subr.mxu0 %v2847_v42 }
0x12d6   :  { %3731 = vmatpush3.msra.mxu0 %v2847_v42  ;;  %3732 = vmatprep.mubr.msk.f32.mxu0 %vm70_vm6, %v2845_v5 }
0x12d7   :  { %3733 = vmatmul.mubr.msk.f32.vlgmr.msra.gmra.mxu0 %vm70_vm6, %v2846_v15 }
0x1397   :  { %v3734_v16 = vpop.f32.mrf.mxu0 }
0x1398   :  { %v2943_v29 = vmul.f32 0.5, %v3734_v16 }
0x1399   :  { %v2933_v39 = vpop.f32.mrf.mxu0 }
0x139a   :  { %2945 = vst.msk [vmem:[#allocation2 + $0x8] sm:$0xff] %vm2719_vm9, %v2943_v29  ;;  %v2942_v12 = vmul.f32 0.5, %v2933_v39 }
0x139c   :  { %2944 = vst.msk [vmem:[#allocation2] sm:$0xff] %vm2719_vm9, %v2942_v12 }
0x139d   :  { %3849 = shalt.err (!%p3846_p4)
}
0x139e   :  { %s3867_s22 = smov 128   ;;  %s3868_s23 = smov 8  }
0x139f   :  { %2957 = dma.vmem_to_hbm [thread:$0]  %s2952_s20, 256, %s4988_s2, [#allocation3], %s3867_s22, %s3867_s22, %s3868_s23  }
0x13a0   :  { %3858 = dma.done.wait [#allocation3], 256  }
0x13a1   :  { %3859 = vsyncadd [#allocation3], 4294967040 }
0x13a2   :  { %2961 = vsyncpa [#allocation3], 1 }

</bundles_post_ra>
